<compile_context>
chip_gen: v7x
topology: tpu7x:2x2x1
jax: 0.10.0
libtpu: 0.0.40
codegen_flags: <defaults>
</compile_context>

<pallas_src>
import functools

import jax
import jax.numpy as jnp
from jax.experimental import pallas as pl
from jax.experimental.pallas import tpu as pltpu

MATMUL_DTYPE = jnp.bfloat16  # MXU operand dtype; accumulation is always f32.


# ----------------------------- kernel helpers -----------------------------
def _batchnorm_packed(h, gamma_row, beta_row, W, eps=1e-5):
    """Training-mode BN on a lane-packed (N*H, W*C) activation, one stats pass.

    gamma_row / beta_row: (1, C) f32.  Per-channel elements = N*H*W.
    """
    NH, WC = h.shape
    C = gamma_row.shape[1]
    m = NH * W

    s = jnp.sum(h, axis=0, keepdims=True)           # (1, W*C)   sublane reduce
    ss = jnp.sum(h * h, axis=0, keepdims=True)      # (1, W*C)
    stats = jnp.concatenate([s, ss], axis=0)        # (2, W*C)

    # 0/1 selection matrix sel[w*C + c, c] = 1: strided channel reduce on MXU.
    r = jax.lax.broadcasted_iota(jnp.int32, (WC, C), 0)
    c = jax.lax.broadcasted_iota(jnp.int32, (WC, C), 1)
    sel = (r % C == c).astype(jnp.float32)
    stats_c = jnp.dot(stats, sel, preferred_element_type=jnp.float32)  # (2, C)

    mean_c = stats_c[0:1] * (1.0 / m)
    var_c = stats_c[1:2] * (1.0 / m) - mean_c * mean_c      # biased variance
    scale_c = gamma_row * jax.lax.rsqrt(var_c + eps)        # rsqrt -> EUP
    shift_c = beta_row - mean_c * scale_c

    coeff = jnp.concatenate([scale_c, shift_c], axis=0)     # (2, C)
    coeff_p = jnp.concatenate([coeff] * W, axis=1)          # (2, W*C) packed bcast
    return h * coeff_p[0:1] + coeff_p[1:2]


def bottleneck_kernel(x_ref, w1_ref, g1_ref, be1_ref,
                      w2_ref, g2_ref, be2_ref,
                      w3_ref, g3_ref, be3_ref,
                      out_ref, *, H, W):
    NH, _ = x_ref.shape
    WC1 = w2_ref.shape[1]                     # W * C1
    dt = MATMUL_DTYPE

    x = x_ref[...]                            # (N*H, W*Cin) f32, lane-dense

    # ---- conv1 (1x1): one (NH, W*Cin) @ (W*Cin, W*C1) matmul (block-diag W) --
    h1 = jnp.dot(x.astype(dt), w1_ref[...], preferred_element_type=jnp.float32)
    a1 = jnp.maximum(_batchnorm_packed(h1, g1_ref[...], be1_ref[...], W), 0.0)

    # ---- conv2 (3x3, pad=1): kh taps = masked sublane shifts; kw taps are
    # folded into the block-tridiagonal packed weight -> single K=3*W*C1 matmul.
    zrow = jnp.zeros((1, WC1), jnp.float32)
    up = jnp.concatenate([zrow, a1[:-1, :]], axis=0)    # row r -> a1[r-1] (kh=0)
    dn = jnp.concatenate([a1[1:, :], zrow], axis=0)     # row r -> a1[r+1] (kh=2)
    hh = jax.lax.broadcasted_iota(jnp.int32, (NH, WC1), 0) % H
    up = jnp.where(hh == 0, 0.0, up)                    # zero-pad at image top
    dn = jnp.where(hh == H - 1, 0.0, dn)                # zero-pad at image bottom
    taps = jnp.concatenate([up, a1, dn], axis=1)        # (NH, 3*W*C1)
    h2 = jnp.dot(taps.astype(dt), w2_ref[...], preferred_element_type=jnp.float32)
    a2 = jnp.maximum(_batchnorm_packed(h2, g2_ref[...], be2_ref[...], W), 0.0)

    # ---- conv3 (1x1) + bn3 + residual + relu --------------------------------
    h3 = jnp.dot(a2.astype(dt), w3_ref[...], preferred_element_type=jnp.float32)
    y3 = _batchnorm_packed(h3, g3_ref[...], be3_ref[...], W)
    # identity_downsample is None -> identity is the raw input (Cin == C3)
    out_ref[...] = jnp.maximum(y3 + x, 0.0)             # (N*H, W*C3) lane-dense


# ----------------------------- packed weights ------------------------------
def _block_diag(w, W):
    """1x1 conv weight (Cin, Cout) -> (W*Cin, W*Cout) block-diagonal."""
    Cin, Cout = w.shape
    eye = jnp.eye(W, dtype=w.dtype)
    return (eye[:, None, :, None] * w[None, :, None, :]).reshape(W * Cin, W * Cout)


def _banded(w_kh, W):
    """3x3 conv kw-taps (3, Cin, Cout) -> block-tridiagonal (W*Cin, W*Cout)."""
    _, Cin, Cout = w_kh.shape
    d = jnp.arange(W)[:, None] - jnp.arange(W)[None, :]            # w_in - w_out
    blocks = w_kh[jnp.clip(d + 1, 0, 2)] * (jnp.abs(d) <= 1)[:, :, None, None]
    return blocks.transpose(0, 2, 1, 3).reshape(W * Cin, W * Cout)


def block_forward(x, params):
    """x: (N, H, W, Cin) float32 NHWC.  Returns (N, H, W, Cin)."""
    (w1, b1, g1, be1, w2, b2, g2, be2, w3, b3, g3, be3) = params
    del b1, b2, b3  # cancelled exactly by training-mode BN mean subtraction
    N, H, W, Cin = x.shape
    C1 = w1.shape[1]
    C3 = w3.shape[1]
    assert C3 == Cin, "identity_downsample=None requires in_c == out_c*expansion"

    # Lane-dense packing (channels + W on the lane axis); wrapper reshapes are
    # plain XLA layout ops.
    x_p = x.reshape(N * H, W * Cin)
    w1_big = _block_diag(w1, W).astype(MATMUL_DTYPE)                    # (W*Cin, W*C1)
    w2_big = jnp.concatenate([_banded(w2[kh], W) for kh in range(3)],
                             axis=0).astype(MATMUL_DTYPE)               # (3*W*C1, W*C1)
    w3_big = _block_diag(w3, W).astype(MATMUL_DTYPE)                    # (W*C1, W*C3)

    vmem = pl.BlockSpec(memory_space=pltpu.MemorySpace.VMEM)
    kernel = functools.partial(bottleneck_kernel, H=H, W=W)
    out_p = pl.pallas_call(
        kernel,
        out_shape=jax.ShapeDtypeStruct((N * H, W * C3), jnp.float32),
        in_specs=[vmem] * 10,
        out_specs=vmem,
    )(x_p, w1_big, g1, be1, w2_big, g2, be2, w3_big, g3, be3)
    return out_p.reshape(N, H, W, C3)


# --------------------------- reference (plain JAX) --------------------------
def _bn_ref(h, g, b, eps=1e-5):
    mu = jnp.mean(h, axis=(0, 1, 2), keepdims=True)
    var = jnp.mean((h - mu) ** 2, axis=(0, 1, 2), keepdims=True)
    return (h - mu) * jax.lax.rsqrt(var + eps) * g.reshape(1, 1, 1, -1) \
        + b.reshape(1, 1, 1, -1)


def _conv_ref(x, w_hwio, b, padding, dt):
    y = jax.lax.conv_general_dilated(
        x.astype(dt), w_hwio.astype(dt), window_strides=(1, 1), padding=padding,
        dimension_numbers=('NHWC', 'HWIO', 'NHWC'),
        preferred_element_type=jnp.float32)
    return y + b.reshape(1, 1, 1, -1)


def block_ref(x, params, matmul_dtype=jnp.float32):
    (w1, b1, g1, be1, w2, b2, g2, be2, w3, b3, g3, be3) = params
    h = jnp.maximum(_bn_ref(_conv_ref(x, w1[None, None], b1[0],
                                      [(0, 0), (0, 0)], matmul_dtype), g1[0], be1[0]), 0.0)
    h = jnp.maximum(_bn_ref(_conv_ref(h, w2, b2[0],
                                      [(1, 1), (1, 1)], matmul_dtype), g2[0], be2[0]), 0.0)
    h = _bn_ref(_conv_ref(h, w3[None, None], b3[0],
                          [(0, 0), (0, 0)], matmul_dtype), g3[0], be3[0])
    return jnp.maximum(h + x, 0.0)


if __name__ == "__main__":
    # Block(in_c=64, out_c=16): conv1 64->16 (1x1), conv2 16->16 (3x3), conv3 16->64
    N, H, W = 2, 8, 8
    in_c, out_c, expansion = 64, 16, 4
    C1, C3 = out_c, out_c * expansion

    key = jax.random.PRNGKey(0)
    ks = jax.random.split(key, 13)
    x = jax.random.normal(ks[0], (N, H, W, in_c), jnp.float32)

    w1 = 0.1 * jax.random.normal(ks[1], (in_c, C1), jnp.float32)
    b1 = 0.05 * jax.random.normal(ks[2], (1, C1), jnp.float32)
    w2 = 0.1 * jax.random.normal(ks[3], (3, 3, C1, C1), jnp.float32)
    b2 = 0.05 * jax.random.normal(ks[4], (1, C1), jnp.float32)
    w3 = 0.1 * jax.random.normal(ks[5], (C1, C3), jnp.float32)
    b3 = 0.05 * jax.random.normal(ks[6], (1, C3), jnp.float32)
    # BatchNorm affine params (perturbed from default init to exercise the path)
    g1 = 1.0 + 0.1 * jax.random.normal(ks[7], (1, C1), jnp.float32)
    be1 = 0.1 * jax.random.normal(ks[8], (1, C1), jnp.float32)
    g2 = 1.0 + 0.1 * jax.random.normal(ks[9], (1, C1), jnp.float32)
    be2 = 0.1 * jax.random.normal(ks[10], (1, C1), jnp.float32)
    g3 = 1.0 + 0.1 * jax.random.normal(ks[11], (1, C3), jnp.float32)
    be3 = 0.1 * jax.random.normal(ks[12], (1, C3), jnp.float32)

    params = (w1, b1, g1, be1, w2, b2, g2, be2, w3, b3, g3, be3)

    out = jax.block_until_ready(block_forward(x, params))
    assert out.shape == (N, H, W, C3)

    # Structural check: reference using the same bf16 MXU-operand rounding.
    ref_bf = jax.block_until_ready(block_ref(x, params, matmul_dtype=MATMUL_DTYPE))
    err_bf = float(jnp.max(jnp.abs(out - ref_bf)))
    assert jnp.allclose(out, ref_bf, rtol=2e-2, atol=2e-2), err_bf

    # Semantics check vs the full-f32 reference (slack = bf16 operand precision).
    ref32 = jax.block_until_ready(block_ref(x, params, matmul_dtype=jnp.float32))
    err32 = float(jnp.max(jnp.abs(out - ref32)))
    assert jnp.allclose(out, ref32, rtol=2e-2, atol=8e-2), err32

    print("KERNEL_OK")
</pallas_src>

<mosaic_0001>
module attributes {stable_mosaic.version = 11 : i64} {
  func.func @bottleneck_kernel(%arg0: memref<16x512xf32, #tpu.memory_space<vmem>>, %arg1: memref<512x128xbf16, #tpu.memory_space<vmem>>, %arg2: memref<1x16xf32, #tpu.memory_space<vmem>>, %arg3: memref<1x16xf32, #tpu.memory_space<vmem>>, %arg4: memref<384x128xbf16, #tpu.memory_space<vmem>>, %arg5: memref<1x16xf32, #tpu.memory_space<vmem>>, %arg6: memref<1x16xf32, #tpu.memory_space<vmem>>, %arg7: memref<128x512xbf16, #tpu.memory_space<vmem>>, %arg8: memref<1x64xf32, #tpu.memory_space<vmem>>, %arg9: memref<1x64xf32, #tpu.memory_space<vmem>>, %arg10: memref<16x512xf32, #tpu.memory_space<vmem>>) attributes {dimension_semantics = [], scalar_prefetch = 0 : i64, scratch_operands = 0 : i64, tpu.core_type = #tpu.core_type<tc>} {
    %c0 = arith.constant 0 : index
    %c0_0 = arith.constant 0 : index
    %0 = vector.load %arg0[%c0, %c0_0] : memref<16x512xf32, #tpu.memory_space<vmem>>, vector<16x512xf32>
    %1 = arith.truncf %0 : vector<16x512xf32> to vector<16x512xbf16>
    %c0_1 = arith.constant 0 : index
    %c0_2 = arith.constant 0 : index
    %2 = vector.load %arg1[%c0_1, %c0_2] : memref<512x128xbf16, #tpu.memory_space<vmem>>, vector<512x128xbf16>
    %cst = arith.constant dense<0.000000e+00> : vector<16x128xf32>
    %3 = tpu.matmul %1, %2, %cst {dimension_numbers = #tpu.dot_dimension_numbers<[1], [0], [0], [1], [0, 0, 1, 1], [], []>} : vector<16x512xbf16>, vector<512x128xbf16>, vector<16x128xf32> -> vector<16x128xf32>
    %c0_3 = arith.constant 0 : index
    %c0_4 = arith.constant 0 : index
    %4 = vector.load %arg2[%c0_3, %c0_4] : memref<1x16xf32, #tpu.memory_space<vmem>>, vector<1x16xf32>
    %c0_5 = arith.constant 0 : index
    %c0_6 = arith.constant 0 : index
    %5 = vector.load %arg3[%c0_5, %c0_6] : memref<1x16xf32, #tpu.memory_space<vmem>>, vector<1x16xf32>
    %cst_7 = arith.constant dense<0.000000e+00> : vector<128xf32>
    %6 = vector.multi_reduction <add>, %3, %cst_7 [0] : vector<16x128xf32> to vector<128xf32>
    %7 = vector.shape_cast %6 : vector<128xf32> to vector<1x128xf32>
    %8 = arith.mulf %3, %3 : vector<16x128xf32>
    %cst_8 = arith.constant dense<0.000000e+00> : vector<128xf32>
    %9 = vector.multi_reduction <add>, %8, %cst_8 [0] : vector<16x128xf32> to vector<128xf32>
    %10 = vector.shape_cast %9 : vector<128xf32> to vector<1x128xf32>
    %11 = tpu.concatenate %7, %10 in 0 : vector<1x128xf32>, vector<1x128xf32> -> vector<2x128xf32>
    %12 = tpu.iota {dimensions = array<i32: 0>} : vector<128x16xi32>
    %13 = tpu.iota {dimensions = array<i32: 1>} : vector<128x16xi32>
    %c16_i32 = arith.constant 16 : i32
    %c0_i32 = arith.constant 0 : i32
    %14 = arith.cmpi eq, %c16_i32, %c0_i32 : i32
    %c1_i32 = arith.constant 1 : i32
    %15 = arith.select %14, %c1_i32, %c16_i32 : i32
    %16 = vector.broadcast %15 : i32 to vector<128x16xi32>
    %17 = arith.remsi %12, %16 : vector<128x16xi32>
    %c0_i32_9 = arith.constant 0 : i32
    %18 = vector.broadcast %c0_i32_9 : i32 to vector<128x16xi32>
    %19 = arith.cmpi ne, %17, %18 : vector<128x16xi32>
    %c0_i32_10 = arith.constant 0 : i32
    %20 = vector.broadcast %c0_i32_10 : i32 to vector<128x16xi32>
    %21 = arith.cmpi slt, %17, %20 : vector<128x16xi32>
    %c0_i32_11 = arith.constant 0 : i32
    %22 = arith.cmpi slt, %15, %c0_i32_11 : i32
    %23 = vector.broadcast %22 : i1 to vector<128x16xi1>
    %24 = vector.broadcast %23 : vector<128x16xi1> to vector<128x16xi1>
    %25 = arith.xori %21, %24 : vector<128x16xi1>
    %26 = arith.andi %25, %19 : vector<128x16xi1>
    %27 = vector.broadcast %15 : i32 to vector<128x16xi32>
    %28 = arith.addi %17, %27 : vector<128x16xi32>
    %29 = arith.select %26, %28, %17 : vector<128x16xi1>, vector<128x16xi32>
    %30 = arith.cmpi eq, %29, %13 : vector<128x16xi32>
    %31 = arith.extui %30 : vector<128x16xi1> to vector<128x16xi32>
    %32 = arith.sitofp %31 : vector<128x16xi32> to vector<128x16xf32>
    %cst_12 = arith.constant dense<0.000000e+00> : vector<2x16xf32>
    %33 = tpu.matmul %11, %32, %cst_12 {dimension_numbers = #tpu.dot_dimension_numbers<[1], [0], [0], [1], [0, 0, 1, 1], [], []>} : vector<2x128xf32>, vector<128x16xf32>, vector<2x16xf32> -> vector<2x16xf32>
    %34 = vector.extract_strided_slice %33 {offsets = [0, 0], sizes = [1, 16], strides = [1, 1]} : vector<2x16xf32> to vector<1x16xf32>
    %cst_13 = arith.constant 7.812500e-03 : f32
    %35 = vector.broadcast %cst_13 : f32 to vector<1x16xf32>
    %36 = arith.mulf %34, %35 : vector<1x16xf32>
    %37 = vector.extract_strided_slice %33 {offsets = [1, 0], sizes = [1, 16], strides = [1, 1]} : vector<2x16xf32> to vector<1x16xf32>
    %cst_14 = arith.constant 7.812500e-03 : f32
    %38 = vector.broadcast %cst_14 : f32 to vector<1x16xf32>
    %39 = arith.mulf %37, %38 : vector<1x16xf32>
    %40 = arith.mulf %36, %36 : vector<1x16xf32>
    %41 = arith.subf %39, %40 : vector<1x16xf32>
    %cst_15 = arith.constant 9.99999974E-6 : f32
    %42 = vector.broadcast %cst_15 : f32 to vector<1x16xf32>
    %43 = arith.addf %41, %42 : vector<1x16xf32>
    %44 = math.rsqrt %43 : vector<1x16xf32>
    %45 = arith.mulf %4, %44 : vector<1x16xf32>
    %46 = arith.mulf %36, %45 : vector<1x16xf32>
    %47 = arith.subf %5, %46 : vector<1x16xf32>
    %48 = tpu.concatenate %45, %47 in 0 : vector<1x16xf32>, vector<1x16xf32> -> vector<2x16xf32>
    %49 = tpu.concatenate %48, %48, %48, %48, %48, %48, %48, %48 in 1 : vector<2x16xf32>, vector<2x16xf32>, vector<2x16xf32>, vector<2x16xf32>, vector<2x16xf32>, vector<2x16xf32>, vector<2x16xf32>, vector<2x16xf32> -> vector<2x128xf32>
    %50 = vector.extract_strided_slice %49 {offsets = [0, 0], sizes = [1, 128], strides = [1, 1]} : vector<2x128xf32> to vector<1x128xf32>
    %51 = vector.broadcast %50 : vector<1x128xf32> to vector<16x128xf32>
    %52 = arith.mulf %3, %51 : vector<16x128xf32>
    %53 = vector.extract_strided_slice %49 {offsets = [1, 0], sizes = [1, 128], strides = [1, 1]} : vector<2x128xf32> to vector<1x128xf32>
    %54 = vector.broadcast %53 : vector<1x128xf32> to vector<16x128xf32>
    %55 = arith.addf %52, %54 : vector<16x128xf32>
    %cst_16 = arith.constant 0.000000e+00 : f32
    %56 = vector.broadcast %cst_16 : f32 to vector<16x128xf32>
    %57 = arith.maximumf %55, %56 : vector<16x128xf32>
    %cst_17 = arith.constant 0.000000e+00 : f32
    %58 = vector.broadcast %cst_17 : f32 to vector<1x128xf32>
    %59 = vector.extract_strided_slice %57 {offsets = [0, 0], sizes = [15, 128], strides = [1, 1]} : vector<16x128xf32> to vector<15x128xf32>
    %60 = tpu.concatenate %58, %59 in 0 : vector<1x128xf32>, vector<15x128xf32> -> vector<16x128xf32>
    %61 = vector.extract_strided_slice %57 {offsets = [1, 0], sizes = [15, 128], strides = [1, 1]} : vector<16x128xf32> to vector<15x128xf32>
    %62 = tpu.concatenate %61, %58 in 0 : vector<15x128xf32>, vector<1x128xf32> -> vector<16x128xf32>
    %63 = tpu.iota {dimensions = array<i32: 0>} : vector<16x128xi32>
    %c8_i32 = arith.constant 8 : i32
    %c0_i32_18 = arith.constant 0 : i32
    %64 = arith.cmpi eq, %c8_i32, %c0_i32_18 : i32
    %c1_i32_19 = arith.constant 1 : i32
    %65 = arith.select %64, %c1_i32_19, %c8_i32 : i32
    %66 = vector.broadcast %65 : i32 to vector<16x128xi32>
    %67 = arith.remsi %63, %66 : vector<16x128xi32>
    %c0_i32_20 = arith.constant 0 : i32
    %68 = vector.broadcast %c0_i32_20 : i32 to vector<16x128xi32>
    %69 = arith.cmpi ne, %67, %68 : vector<16x128xi32>
    %c0_i32_21 = arith.constant 0 : i32
    %70 = vector.broadcast %c0_i32_21 : i32 to vector<16x128xi32>
    %71 = arith.cmpi slt, %67, %70 : vector<16x128xi32>
    %c0_i32_22 = arith.constant 0 : i32
    %72 = arith.cmpi slt, %65, %c0_i32_22 : i32
    %73 = vector.broadcast %72 : i1 to vector<16x128xi1>
    %74 = vector.broadcast %73 : vector<16x128xi1> to vector<16x128xi1>
    %75 = arith.xori %71, %74 : vector<16x128xi1>
    %76 = arith.andi %75, %69 : vector<16x128xi1>
    %77 = vector.broadcast %65 : i32 to vector<16x128xi32>
    %78 = arith.addi %67, %77 : vector<16x128xi32>
    %79 = arith.select %76, %78, %67 : vector<16x128xi1>, vector<16x128xi32>
    %c0_i32_23 = arith.constant 0 : i32
    %80 = vector.broadcast %c0_i32_23 : i32 to vector<16x128xi32>
    %81 = arith.cmpi eq, %79, %80 : vector<16x128xi32>
    %cst_24 = arith.constant 0.000000e+00 : f32
    %82 = vector.broadcast %cst_24 : f32 to vector<16x128xf32>
    %83 = arith.select %81, %82, %60 : vector<16x128xi1>, vector<16x128xf32>
    %c7_i32 = arith.constant 7 : i32
    %84 = vector.broadcast %c7_i32 : i32 to vector<16x128xi32>
    %85 = arith.cmpi eq, %79, %84 : vector<16x128xi32>
    %cst_25 = arith.constant 0.000000e+00 : f32
    %86 = vector.broadcast %cst_25 : f32 to vector<16x128xf32>
    %87 = arith.select %85, %86, %62 : vector<16x128xi1>, vector<16x128xf32>
    %88 = tpu.concatenate %83, %57, %87 in 1 : vector<16x128xf32>, vector<16x128xf32>, vector<16x128xf32> -> vector<16x384xf32>
    %89 = arith.truncf %88 : vector<16x384xf32> to vector<16x384xbf16>
    %c0_26 = arith.constant 0 : index
    %c0_27 = arith.constant 0 : index
    %90 = vector.load %arg4[%c0_26, %c0_27] : memref<384x128xbf16, #tpu.memory_space<vmem>>, vector<384x128xbf16>
    %cst_28 = arith.constant dense<0.000000e+00> : vector<16x128xf32>
    %91 = tpu.matmul %89, %90, %cst_28 {dimension_numbers = #tpu.dot_dimension_numbers<[1], [0], [0], [1], [0, 0, 1, 1], [], []>} : vector<16x384xbf16>, vector<384x128xbf16>, vector<16x128xf32> -> vector<16x128xf32>
    %c0_29 = arith.constant 0 : index
    %c0_30 = arith.constant 0 : index
    %92 = vector.load %arg5[%c0_29, %c0_30] : memref<1x16xf32, #tpu.memory_space<vmem>>, vector<1x16xf32>
    %c0_31 = arith.constant 0 : index
    %c0_32 = arith.constant 0 : index
    %93 = vector.load %arg6[%c0_31, %c0_32] : memref<1x16xf32, #tpu.memory_space<vmem>>, vector<1x16xf32>
    %cst_33 = arith.constant dense<0.000000e+00> : vector<128xf32>
    %94 = vector.multi_reduction <add>, %91, %cst_33 [0] : vector<16x128xf32> to vector<128xf32>
    %95 = vector.shape_cast %94 : vector<128xf32> to vector<1x128xf32>
    %96 = arith.mulf %91, %91 : vector<16x128xf32>
    %cst_34 = arith.constant dense<0.000000e+00> : vector<128xf32>
    %97 = vector.multi_reduction <add>, %96, %cst_34 [0] : vector<16x128xf32> to vector<128xf32>
    %98 = vector.shape_cast %97 : vector<128xf32> to vector<1x128xf32>
    %99 = tpu.concatenate %95, %98 in 0 : vector<1x128xf32>, vector<1x128xf32> -> vector<2x128xf32>
    %100 = tpu.iota {dimensions = array<i32: 0>} : vector<128x16xi32>
    %101 = tpu.iota {dimensions = array<i32: 1>} : vector<128x16xi32>
    %c16_i32_35 = arith.constant 16 : i32
    %c0_i32_36 = arith.constant 0 : i32
    %102 = arith.cmpi eq, %c16_i32_35, %c0_i32_36 : i32
    %c1_i32_37 = arith.constant 1 : i32
    %103 = arith.select %102, %c1_i32_37, %c16_i32_35 : i32
    %104 = vector.broadcast %103 : i32 to vector<128x16xi32>
    %105 = arith.remsi %100, %104 : vector<128x16xi32>
    %c0_i32_38 = arith.constant 0 : i32
    %106 = vector.broadcast %c0_i32_38 : i32 to vector<128x16xi32>
    %107 = arith.cmpi ne, %105, %106 : vector<128x16xi32>
    %c0_i32_39 = arith.constant 0 : i32
    %108 = vector.broadcast %c0_i32_39 : i32 to vector<128x16xi32>
    %109 = arith.cmpi slt, %105, %108 : vector<128x16xi32>
    %c0_i32_40 = arith.constant 0 : i32
    %110 = arith.cmpi slt, %103, %c0_i32_40 : i32
    %111 = vector.broadcast %110 : i1 to vector<128x16xi1>
    %112 = vector.broadcast %111 : vector<128x16xi1> to vector<128x16xi1>
    %113 = arith.xori %109, %112 : vector<128x16xi1>
    %114 = arith.andi %113, %107 : vector<128x16xi1>
    %115 = vector.broadcast %103 : i32 to vector<128x16xi32>
    %116 = arith.addi %105, %115 : vector<128x16xi32>
    %117 = arith.select %114, %116, %105 : vector<128x16xi1>, vector<128x16xi32>
    %118 = arith.cmpi eq, %117, %101 : vector<128x16xi32>
    %119 = arith.extui %118 : vector<128x16xi1> to vector<128x16xi32>
    %120 = arith.sitofp %119 : vector<128x16xi32> to vector<128x16xf32>
    %cst_41 = arith.constant dense<0.000000e+00> : vector<2x16xf32>
    %121 = tpu.matmul %99, %120, %cst_41 {dimension_numbers = #tpu.dot_dimension_numbers<[1], [0], [0], [1], [0, 0, 1, 1], [], []>} : vector<2x128xf32>, vector<128x16xf32>, vector<2x16xf32> -> vector<2x16xf32>
    %122 = vector.extract_strided_slice %121 {offsets = [0, 0], sizes = [1, 16], strides = [1, 1]} : vector<2x16xf32> to vector<1x16xf32>
    %cst_42 = arith.constant 7.812500e-03 : f32
    %123 = vector.broadcast %cst_42 : f32 to vector<1x16xf32>
    %124 = arith.mulf %122, %123 : vector<1x16xf32>
    %125 = vector.extract_strided_slice %121 {offsets = [1, 0], sizes = [1, 16], strides = [1, 1]} : vector<2x16xf32> to vector<1x16xf32>
    %cst_43 = arith.constant 7.812500e-03 : f32
    %126 = vector.broadcast %cst_43 : f32 to vector<1x16xf32>
    %127 = arith.mulf %125, %126 : vector<1x16xf32>
    %128 = arith.mulf %124, %124 : vector<1x16xf32>
    %129 = arith.subf %127, %128 : vector<1x16xf32>
    %cst_44 = arith.constant 9.99999974E-6 : f32
    %130 = vector.broadcast %cst_44 : f32 to vector<1x16xf32>
    %131 = arith.addf %129, %130 : vector<1x16xf32>
    %132 = math.rsqrt %131 : vector<1x16xf32>
    %133 = arith.mulf %92, %132 : vector<1x16xf32>
    %134 = arith.mulf %124, %133 : vector<1x16xf32>
    %135 = arith.subf %93, %134 : vector<1x16xf32>
    %136 = tpu.concatenate %133, %135 in 0 : vector<1x16xf32>, vector<1x16xf32> -> vector<2x16xf32>
    %137 = tpu.concatenate %136, %136, %136, %136, %136, %136, %136, %136 in 1 : vector<2x16xf32>, vector<2x16xf32>, vector<2x16xf32>, vector<2x16xf32>, vector<2x16xf32>, vector<2x16xf32>, vector<2x16xf32>, vector<2x16xf32> -> vector<2x128xf32>
    %138 = vector.extract_strided_slice %137 {offsets = [0, 0], sizes = [1, 128], strides = [1, 1]} : vector<2x128xf32> to vector<1x128xf32>
    %139 = vector.broadcast %138 : vector<1x128xf32> to vector<16x128xf32>
    %140 = arith.mulf %91, %139 : vector<16x128xf32>
    %141 = vector.extract_strided_slice %137 {offsets = [1, 0], sizes = [1, 128], strides = [1, 1]} : vector<2x128xf32> to vector<1x128xf32>
    %142 = vector.broadcast %141 : vector<1x128xf32> to vector<16x128xf32>
    %143 = arith.addf %140, %142 : vector<16x128xf32>
    %cst_45 = arith.constant 0.000000e+00 : f32
    %144 = vector.broadcast %cst_45 : f32 to vector<16x128xf32>
    %145 = arith.maximumf %143, %144 : vector<16x128xf32>
    %146 = arith.truncf %145 : vector<16x128xf32> to vector<16x128xbf16>
    %c0_46 = arith.constant 0 : index
    %c0_47 = arith.constant 0 : index
    %147 = vector.load %arg7[%c0_46, %c0_47] : memref<128x512xbf16, #tpu.memory_space<vmem>>, vector<128x512xbf16>
    %cst_48 = arith.constant dense<0.000000e+00> : vector<16x512xf32>
    %148 = tpu.matmul %146, %147, %cst_48 {dimension_numbers = #tpu.dot_dimension_numbers<[1], [0], [0], [1], [0, 0, 1, 1], [], []>} : vector<16x128xbf16>, vector<128x512xbf16>, vector<16x512xf32> -> vector<16x512xf32>
    %c0_49 = arith.constant 0 : index
    %c0_50 = arith.constant 0 : index
    %149 = vector.load %arg8[%c0_49, %c0_50] : memref<1x64xf32, #tpu.memory_space<vmem>>, vector<1x64xf32>
    %c0_51 = arith.constant 0 : index
    %c0_52 = arith.constant 0 : index
    %150 = vector.load %arg9[%c0_51, %c0_52] : memref<1x64xf32, #tpu.memory_space<vmem>>, vector<1x64xf32>
    %cst_53 = arith.constant dense<0.000000e+00> : vector<512xf32>
    %151 = vector.multi_reduction <add>, %148, %cst_53 [0] : vector<16x512xf32> to vector<512xf32>
    %152 = vector.shape_cast %151 : vector<512xf32> to vector<1x512xf32>
    %153 = arith.mulf %148, %148 : vector<16x512xf32>
    %cst_54 = arith.constant dense<0.000000e+00> : vector<512xf32>
    %154 = vector.multi_reduction <add>, %153, %cst_54 [0] : vector<16x512xf32> to vector<512xf32>
    %155 = vector.shape_cast %154 : vector<512xf32> to vector<1x512xf32>
    %156 = tpu.concatenate %152, %155 in 0 : vector<1x512xf32>, vector<1x512xf32> -> vector<2x512xf32>
    %157 = tpu.iota {dimensions = array<i32: 0>} : vector<512x64xi32>
    %158 = tpu.iota {dimensions = array<i32: 1>} : vector<512x64xi32>
    %c64_i32 = arith.constant 64 : i32
    %c0_i32_55 = arith.constant 0 : i32
    %159 = arith.cmpi eq, %c64_i32, %c0_i32_55 : i32
    %c1_i32_56 = arith.constant 1 : i32
    %160 = arith.select %159, %c1_i32_56, %c64_i32 : i32
    %161 = vector.broadcast %160 : i32 to vector<512x64xi32>
    %162 = arith.remsi %157, %161 : vector<512x64xi32>
    %c0_i32_57 = arith.constant 0 : i32
    %163 = vector.broadcast %c0_i32_57 : i32 to vector<512x64xi32>
    %164 = arith.cmpi ne, %162, %163 : vector<512x64xi32>
    %c0_i32_58 = arith.constant 0 : i32
    %165 = vector.broadcast %c0_i32_58 : i32 to vector<512x64xi32>
    %166 = arith.cmpi slt, %162, %165 : vector<512x64xi32>
    %c0_i32_59 = arith.constant 0 : i32
    %167 = arith.cmpi slt, %160, %c0_i32_59 : i32
    %168 = vector.broadcast %167 : i1 to vector<512x64xi1>
    %169 = vector.broadcast %168 : vector<512x64xi1> to vector<512x64xi1>
    %170 = arith.xori %166, %169 : vector<512x64xi1>
    %171 = arith.andi %170, %164 : vector<512x64xi1>
    %172 = vector.broadcast %160 : i32 to vector<512x64xi32>
    %173 = arith.addi %162, %172 : vector<512x64xi32>
    %174 = arith.select %171, %173, %162 : vector<512x64xi1>, vector<512x64xi32>
    %175 = arith.cmpi eq, %174, %158 : vector<512x64xi32>
    %176 = arith.extui %175 : vector<512x64xi1> to vector<512x64xi32>
    %177 = arith.sitofp %176 : vector<512x64xi32> to vector<512x64xf32>
    %cst_60 = arith.constant dense<0.000000e+00> : vector<2x64xf32>
    %178 = tpu.matmul %156, %177, %cst_60 {dimension_numbers = #tpu.dot_dimension_numbers<[1], [0], [0], [1], [0, 0, 1, 1], [], []>} : vector<2x512xf32>, vector<512x64xf32>, vector<2x64xf32> -> vector<2x64xf32>
    %179 = vector.extract_strided_slice %178 {offsets = [0, 0], sizes = [1, 64], strides = [1, 1]} : vector<2x64xf32> to vector<1x64xf32>
    %cst_61 = arith.constant 7.812500e-03 : f32
    %180 = vector.broadcast %cst_61 : f32 to vector<1x64xf32>
    %181 = arith.mulf %179, %180 : vector<1x64xf32>
    %182 = vector.extract_strided_slice %178 {offsets = [1, 0], sizes = [1, 64], strides = [1, 1]} : vector<2x64xf32> to vector<1x64xf32>
    %cst_62 = arith.constant 7.812500e-03 : f32
    %183 = vector.broadcast %cst_62 : f32 to vector<1x64xf32>
    %184 = arith.mulf %182, %183 : vector<1x64xf32>
    %185 = arith.mulf %181, %181 : vector<1x64xf32>
    %186 = arith.subf %184, %185 : vector<1x64xf32>
    %cst_63 = arith.constant 9.99999974E-6 : f32
    %187 = vector.broadcast %cst_63 : f32 to vector<1x64xf32>
    %188 = arith.addf %186, %187 : vector<1x64xf32>
    %189 = math.rsqrt %188 : vector<1x64xf32>
    %190 = arith.mulf %149, %189 : vector<1x64xf32>
    %191 = arith.mulf %181, %190 : vector<1x64xf32>
    %192 = arith.subf %150, %191 : vector<1x64xf32>
    %193 = tpu.concatenate %190, %192 in 0 : vector<1x64xf32>, vector<1x64xf32> -> vector<2x64xf32>
    %194 = tpu.concatenate %193, %193, %193, %193, %193, %193, %193, %193 in 1 : vector<2x64xf32>, vector<2x64xf32>, vector<2x64xf32>, vector<2x64xf32>, vector<2x64xf32>, vector<2x64xf32>, vector<2x64xf32>, vector<2x64xf32> -> vector<2x512xf32>
    %195 = vector.extract_strided_slice %194 {offsets = [0, 0], sizes = [1, 512], strides = [1, 1]} : vector<2x512xf32> to vector<1x512xf32>
    %196 = vector.broadcast %195 : vector<1x512xf32> to vector<16x512xf32>
    %197 = arith.mulf %148, %196 : vector<16x512xf32>
    %198 = vector.extract_strided_slice %194 {offsets = [1, 0], sizes = [1, 512], strides = [1, 1]} : vector<2x512xf32> to vector<1x512xf32>
    %199 = vector.broadcast %198 : vector<1x512xf32> to vector<16x512xf32>
    %200 = arith.addf %197, %199 : vector<16x512xf32>
    %201 = arith.addf %200, %0 : vector<16x512xf32>
    %cst_64 = arith.constant 0.000000e+00 : f32
    %202 = vector.broadcast %cst_64 : f32 to vector<16x512xf32>
    %203 = arith.maximumf %201, %202 : vector<16x512xf32>
    %c0_65 = arith.constant 0 : index
    %c0_66 = arith.constant 0 : index
    %204 = vector.load %arg10[%c0_65, %c0_66] : memref<16x512xf32, #tpu.memory_space<vmem>>, vector<16x512xf32>
    tpu.vector_store %arg10[%c0_65, %c0_66], %203 {strides = array<i32>} : memref<16x512xf32, #tpu.memory_space<vmem>>, vector<16x512xf32>,
    return
  }
}

</mosaic_0001>

<bundles_post_ra>
// kernel: tpu_custom_call.1
= control target key start
LH: loop header
LB: loop body
LE: loop exit
PB: predicated region body
PF: predicated region fallthrough
CT: control target
= control target key end

     0   :  { %15 = vsyncpa [#allocation3], 0  ;;  %s4876_s0 = inlined_call_operand.hbm [shape: f32[16,512], index: 0, kind: input, shape index: {}]   ;;  %s4877_s1 = inlined_call_operand.hbm [shape: bf16[512,128], index: 1, kind: input, shape index: {}]   ;;  %s4878_s2 = inlined_call_operand.vmem [shape: f32[1,16], index: 2, kind: input, shape index: {}]   ;;  %s4879_s3 = inlined_call_operand.vmem [shape: f32[1,16], index: 3, kind: input, shape index: {}]   ;;  %s4880_s4 = inlined_call_operand.hbm [shape: bf16[384,128], index: 4, kind: input, shape index: {}]   ;;  %s4881_s5 = inlined_call_operand.vmem [shape: f32[1,16], index: 5, kind: input, shape index: {}]   ;;  %s4882_s6 = inlined_call_operand.vmem [shape: f32[1,16], index: 6, kind: input, shape index: {}]   ;;  %s4883_s7 = inlined_call_operand.hbm [shape: bf16[128,512], index: 7, kind: input, shape index: {}]   ;;  %s4884_s8 = inlined_call_operand.vmem [shape: f32[1,64], index: 8, kind: input, shape index: {}]   ;;  %s4885_s9 = inlined_call_operand.vmem [shape: f32[1,64], index: 9, kind: input, shape index: {}]   ;;  %s4886_s10 = inlined_call_operand.hbm [shape: f32[16,512], index: 10, kind: output, shape index: {}]  }
   0x1   :  { %16 = vsyncpa [#allocation6], 0 }
   0x2   :  { %17 = vsyncpa [#allocation9], 0 }
   0x3   :  { %18 = vsyncpa [#allocation4], 0  ;;  %s3887_s13 = smov [#allocation5]   ;;  %s3769_s17 = scalar_lea.hbm %s4877_s1, 4096 }
   0x4   :  { %s36_s14 = sshll.u32 %s3887_s13, 4  ;;  %p3770_p0 = scmp.ne.s32.totalorder %s4877_s1, %s3769_s17  ;;  %s37_s14 = int_to_ptr.vmem [resolvable:$true] %s36_s14 }
   0x5   :  { %p3773_p1 = scmp.lt.u32.totalorder %s3769_s17, %s4877_s1 }
   0x7   :  { %p3775_p2 = pnand %p3773_p1, %p3770_p0 }
   0x9   :  { %3778 = shalt.err (!%p3775_p2)
}
   0xa   :  { %s3779_s22 = scalar_lea.vmem %s37_s14, 4096  ;;  %p3784_p4 = scmp.lt.s32.totalorder %s37_s14, %s37_s14 }
   0xb   :  { %p3780_p3 = scmp.ne.s32.totalorder %s37_s14, %s3779_s22  ;;  %p3785_p5 = scmp.lt.s32.totalorder %s3779_s22, %s3779_s22 }
   0xd   :  { %p3786_p6 = por %p3785_p5, %p3784_p4 }
   0xf   :  { %p3787_p7 = pnand %p3786_p6, %p3780_p3 }
  0x11   :  { %3790 = shalt.err (!%p3787_p7)
}
  0x12   :  { %s3888_s23 = smov 64   ;;  %s3889_s24 = smov 4  }
  0x13   :  { %42 = dma.hbm_to_vmem [thread:$0]  %s4877_s1, 4096, %s37_s14, [#allocation6], %s3888_s23, %s3888_s23, %s3889_s24  }
  0x14   :  { %s3890_s27 = smov [#allocation2]   ;;  %s3791_s11 = scalar_lea.hbm %s4876_s0, 1024 }
  0x15   :  { %s24_s28 = sshll.u32 %s3890_s27, 4  ;;  %p3792_p8 = scmp.ne.s32.totalorder %s4876_s0, %s3791_s11  ;;  %s25_s28 = int_to_ptr.vmem [resolvable:$true] %s24_s28 }
  0x16   :  { %p3795_p9 = scmp.lt.u32.totalorder %s3791_s11, %s4876_s0 }
  0x18   :  { %p3797_p10 = pnand %p3795_p9, %p3792_p8 }
  0x1a   :  { %3800 = shalt.err (!%p3797_p10)
}
  0x1b   :  { %s3801_s17 = scalar_lea.vmem %s25_s28, 1024  ;;  %p3806_p12 = scmp.lt.s32.totalorder %s25_s28, %s25_s28 }
  0x1c   :  { %p3802_p11 = scmp.ne.s32.totalorder %s25_s28, %s3801_s17  ;;  %p3807_p13 = scmp.lt.s32.totalorder %s3801_s17, %s3801_s17 }
  0x1e   :  { %p3808_p0 = por %p3807_p13, %p3806_p12 }
  0x20   :  { %p3809_p1 = pnand %p3808_p0, %p3802_p11 }
  0x22   :  { %3812 = shalt.err (!%p3809_p1)
}
  0x23   :  { %s3891_s1 = smov 512   ;;  %s3892_s14 = smov 32  }
  0x24   :  { %30 = dma.hbm_to_vmem [thread:$0]  %s4876_s0, 1024, %s25_s28, [#allocation3], %s3891_s1, %s3891_s1, %s3892_s14  }
  0x25   :  { %s3893_s20 = smov [#allocation7]   ;;  %s3894_s22 = smov [#allocation8]  }
  0x26   :  { %s52_s21 = sshll.u32 %s3893_s20, 4  ;;  %s68_s25 = sshll.u32 %s3894_s22, 4  ;;  %s53_s21 = int_to_ptr.vmem [resolvable:$true] %s52_s21  ;;  %s3993_s25 = int_to_ptr.vmem [resolvable:$true] %s68_s25 }
  0x27   :  { %s3813_s29 = scalar_lea.hbm %s4880_s4, 3072 }
  0x28   :  { %p3814_p2 = scmp.ne.s32.totalorder %s4880_s4, %s3813_s29  ;;  %p3817_p3 = scmp.lt.u32.totalorder %s3813_s29, %s4880_s4 }
  0x2a   :  { %p3819_p4 = pnand %p3817_p3, %p3814_p2 }
  0x2c   :  { %3822 = shalt.err (!%p3819_p4)
}
  0x2d   :  { %s3823_s0 = scalar_lea.vmem %s53_s21, 3072  ;;  %p3828_p6 = scmp.lt.s32.totalorder %s53_s21, %s53_s21 }
  0x2e   :  { %p3824_p5 = scmp.ne.s32.totalorder %s53_s21, %s3823_s0  ;;  %p3829_p7 = scmp.lt.s32.totalorder %s3823_s0, %s3823_s0 }
  0x30   :  { %p3830_p8 = por %p3829_p7, %p3828_p6 }
  0x32   :  { %p3831_p9 = pnand %p3830_p8, %p3824_p5 }
  0x34   :  { %3834 = shalt.err (!%p3831_p9)
}
  0x35   :  { %58 = dma.hbm_to_vmem [thread:$0]  %s4880_s4, 3072, %s53_s21, [#allocation6], %s3888_s23, %s3888_s23, %s3889_s24  }
  0x36   :  { %s3835_s18 = scalar_lea.hbm %s4883_s7, 4096 }
  0x37   :  { %p3836_p10 = scmp.ne.s32.totalorder %s4883_s7, %s3835_s18  ;;  %p3839_p11 = scmp.lt.u32.totalorder %s3835_s18, %s4883_s7 }
  0x39   :  { %p3841_p12 = pnand %p3839_p11, %p3836_p10 }
  0x3b   :  { %3844 = shalt.err (!%p3841_p12)
}
  0x3c   :  { %s3845_s27 = scalar_lea.vmem %s3993_s25, 4096  ;;  %p3850_p0 = scmp.lt.s32.totalorder %s3993_s25, %s3993_s25 }
  0x3d   :  { %p3846_p13 = scmp.ne.s32.totalorder %s3993_s25, %s3845_s27  ;;  %p3851_p1 = scmp.lt.s32.totalorder %s3845_s27, %s3845_s27 }
  0x3f   :  { %p3852_p2 = por %p3851_p1, %p3850_p0 }
  0x41   :  { %p3853_p3 = pnand %p3852_p2, %p3846_p13 }
  0x43   :  { %3856 = shalt.err (!%p3853_p3)
}
  0x44   :  { %s3895_s4 = smov 256   ;;  %s3896_s24 = smov 16  }
  0x45   :  { %74 = dma.hbm_to_vmem [thread:$0]  %s4883_s7, 4096, %s3993_s25, [#allocation9], %s3895_s4, %s3895_s4, %s3896_s24  }
  0x46   :  { %3879 = dma.done.wait [#allocation3], 1024  }
  0x47   :  { %3880 = vsyncadd [#allocation3], 4294966272 }
  0x48   :  { %3881 = dma.done.wait [#allocation6], 7168  }
  0x49   :  { %3882 = vsyncadd [#allocation6], 4294960128 }
  0x4a   :  { %3883 = dma.done.wait [#allocation9], 4096  }
  0x4b   :  { %3884 = vsyncadd [#allocation9], 4294963200  ;;  %v3651_v0 = vld [vmem:[#allocation5 + $0x40] sm:$0xff]   ;;  %v3655_v4 = vld [vmem:[#allocation5 + $0x48] sm:$0xff]   ;;  %v462_v15 = vlaneseq  ;;  %v3897_v53 = vmov 0.0|0.0   ;;  %s3904_s12 = smov 80  }
  0x4c   :  { %v3652_v1 = vld [vmem:[#allocation5 + $0xc0] sm:$0xff]   ;;  %3249 = vmatprep.subr.bf16.mxu0 %v3651_v0  ;;  %v3656_v5 = vld [vmem:[#allocation5 + $0xc8] sm:$0xff]   ;;  %v3659_v8 = vld [vmem:[#allocation5 + $0x50] sm:$0xff]   ;;  %v3898_v59 = vmov 1.0|1.0   ;;  %s3905_s13 = smov 112  }
  0x4d   :  { %v3653_v2 = vld [vmem:[#allocation5] sm:$0xff]   ;;  %3271 = vmatprep.subr.bf16.mxu1 %v3652_v1  ;;  %v3657_v6 = vld [vmem:[#allocation5 + $0x8] sm:$0xff]   ;;  %v3660_v9 = vld [vmem:[#allocation5 + $0xd0] sm:$0xff]   ;;  %v4028_v20 = vshrl.u32 %v462_v15, 7  ;;  %v4030_v24 = vand.u32 127, %v462_v15 }
  0x4e   :  { %v3654_v3 = vld [vmem:[#allocation5 + $0x80] sm:$0xff]   ;;  %3250 = vmatpush3.bf16.msra.mxu0 %v3653_v2  ;;  %v3658_v7 = vld [vmem:[#allocation5 + $0x88] sm:$0xff]   ;;  %v3661_v10 = vld [vmem:[#allocation5 + $0x10] sm:$0xff]  }
  0x4f   :  { %3272 = vmatpush3.bf16.msra.mxu1 %v3654_v3  ;;  %3251 = vmatprep.subr.bf16.mxu0 %v3655_v4  ;;  %v3662_v11 = vld [vmem:[#allocation5 + $0x90] sm:$0xff]   ;;  %v3663_v12 = vld [vmem:[#allocation5 + $0x58] sm:$0xff]   ;;  %v3667_v17 = vld [vmem:[#allocation5 + $0x60] sm:$0xff]   ;;  %v4033_v26 = vadd.s32 8, %v4028_v20  ;;  %v4036_v28 = vadd.s32 16, %v4028_v20  ;;  %v4039_v30 = vadd.s32 24, %v4028_v20 }
  0x50   :  { %3273 = vmatprep.subr.bf16.mxu1 %v3656_v5  ;;  %v3664_v13 = vld [vmem:[#allocation5 + $0xd8] sm:$0xff]   ;;  %v3668_v18 = vld [vmem:[#allocation5 + $0xe0] sm:$0xff]   ;;  %v3671_v22 = vld [vmem:[#allocation5 + $0x68] sm:$0xff]   ;;  %v485_v32 = vand.u32 15, %v4028_v20  ;;  %v4089_v60 = vadd.s32 32, %v4028_v20  ;;  %v4092_v61 = vadd.s32 40, %v4028_v20 }
  0x51   :  { %v3665_v14 = vld [vmem:[#allocation5 + $0x18] sm:$0xff]   ;;  %v3669_v19 = vld [vmem:[#allocation5 + $0x20] sm:$0xff]   ;;  %v3672_v23 = vld [vmem:[#allocation5 + $0xe8] sm:$0xff]   ;;  %v492_v34 = vand.u32 15, %v4033_v26  ;;  %v499_v36 = vand.u32 15, %v4036_v28  ;;  %v506_v38 = vand.u32 15, %v4039_v30 }
  0x52   :  { %3252 = vmatpush3.bf16.msra.mxu0 %v3657_v6  ;;  %v3666_v16 = vld [vmem:[#allocation5 + $0x98] sm:$0xff]   ;;  %v3670_v21 = vld [vmem:[#allocation5 + $0xa0] sm:$0xff]   ;;  %v3673_v25 = vld [vmem:[#allocation5 + $0x28] sm:$0xff]   ;;  %vm4046_vm0 = vcmp.eq.s32.totalorder %v485_v32, %v4030_v24  ;;  %v513_v62 = vand.u32 15, %v4089_v60  ;;  %v520_v63 = vand.u32 15, %v4092_v61  ;;  %v4107_v2 = vadd.s32 48, %v4028_v20 }
  0x53   :  { %3274 = vmatpush3.bf16.msra.mxu1 %v3658_v7  ;;  %3253 = vmatprep.subr.bf16.mxu0 %v3659_v8  ;;  %v3674_v27 = vld [vmem:[#allocation5 + $0xa8] sm:$0xff]   ;;  %v3675_v29 = vld [vmem:[#allocation5 + $0x70] sm:$0xff]   ;;  %v3679_v37 = vld [vmem:[#allocation5 + $0x78] sm:$0xff]   ;;  %vm4051_vm1 = vcmp.eq.s32.totalorder %v492_v34, %v4030_v24  ;;  %vm4056_vm2 = vcmp.eq.s32.totalorder %v499_v36, %v4030_v24  ;;  %vm4061_vm3 = vcmp.eq.s32.totalorder %v506_v38, %v4030_v24  ;;  %v4110_v3 = vadd.s32 56, %v4028_v20 }
  0x54   :  { %3275 = vmatprep.subr.bf16.mxu1 %v3660_v9  ;;  %v3676_v31 = vld [vmem:[#allocation5 + $0xf0] sm:$0xff]   ;;  %v3680_v39 = vld [vmem:[#allocation5 + $0xf8] sm:$0xff]   ;;  %v93_v44 = vld [vmem:[#allocation2 + $0x8] sm:$0xff]  ;;  %vm4097_vm6 = vcmp.eq.s32.totalorder %v513_v62, %v4030_v24  ;;  %vm4102_vm7 = vcmp.eq.s32.totalorder %v520_v63, %v4030_v24  ;;  %v527_v4 = vand.u32 15, %v4107_v2  ;;  %v4927_v6 = vmov 0 }
  0x55   :  { %v3677_v33 = vld [vmem:[#allocation5 + $0x30] sm:$0xff]   ;;  %v3681_v40 = vld [vmem:[#allocation5 + $0x38] sm:$0xff]   ;;  %v97_v45 = vld [vmem:[#allocation2 + $0x28] sm:$0xff]  ;;  %v534_v5 = vand.u32 15, %v4110_v3  ;;  %v4929_v7 = vmov 0  ;;  %v4136_v8 = vadd.s32 64, %v4028_v20 }
  0x56   :  { %3254 = vmatpush3.bf16.msra.mxu0 %v3661_v10  ;;  %v3678_v35 = vld [vmem:[#allocation5 + $0xb0] sm:$0xff]   ;;  %v3682_v41 = vld [vmem:[#allocation5 + $0xb8] sm:$0xff]   ;;  %v101_v49 = vpack.c.bf16 %v97_v45, %v93_v44  ;;  %v92_v51 = vld [vmem:[#allocation2] sm:$0xff]  ;;  %vm4126_vm9 = vcmp.eq.s32.totalorder %v527_v4, %v4030_v24  ;;  %v4139_v9 = vadd.s32 72, %v4028_v20  ;;  %v4168_v15 = vadd.s32 88, %v4028_v20 }
  0x57   :  { %3276 = vmatpush3.bf16.msra.mxu1 %v3662_v11  ;;  %3255 = vmatprep.subr.bf16.mxu0 %v3663_v12  ;;  %v95_v46 = vld [vmem:[#allocation2 + $0x18] sm:$0xff]  ;;  %v96_v52 = vld [vmem:[#allocation2 + $0x20] sm:$0xff]  ;;  %v94_v56 = vld [vmem:[#allocation2 + $0x10] sm:$0xff]  ;;  %v4928_v6 = vsel %vm4126_vm9, 4294967295, %v4927_v6  ;;  %vm4131_vm10 = vcmp.eq.s32.totalorder %v534_v5, %v4030_v24  ;;  %v541_v10 = vand.u32 15, %v4136_v8  ;;  %v4931_v12 = vmov 0 }
  0x58   :  { %3277 = vmatprep.subr.bf16.mxu1 %v3664_v13  ;;  %v99_v50 = vld [vmem:[#allocation2 + $0x38] sm:$0xff]  ;;  %v100_v55 = vpack.c.bf16 %v96_v52, %v92_v51  ;;  %v98_v57 = vld [vmem:[#allocation2 + $0x30] sm:$0xff]  ;;  %vm4892_vm4 = vmpackc.low %vm4051_vm1, %vm4046_vm0  ;;  %392 = vmatprep.mubr.bf16.mxu0 %v101_v49  ;;  %v4930_v7 = vsel %vm4131_vm10, 4294967295, %v4929_v7  ;;  %v548_v11 = vand.u32 15, %v4139_v9  ;;  %v4933_v13 = vmov 0 }
  0x59   :  { %v103_v54 = vpack.c.bf16 %v99_v50, %v95_v46  ;;  %v102_v58 = vpack.c.bf16 %v98_v57, %v94_v56  ;;  %vm4890_vm5 = vmpackc.low %vm4061_vm3, %vm4056_vm2  ;;  %vm4155_vm12 = vcmp.eq.s32.totalorder %v541_v10, %v4030_v24  ;;  %v4941_v32 = vmov 0 }
  0x5a   :  { %3256 = vmatpush3.bf16.msra.mxu0 %v3665_v14  ;;  %vm4889_vm8 = vmpackc.low %vm4102_vm7, %vm4097_vm6  ;;  %v4932_v12 = vsel %vm4155_vm12, 4294967295, %v4931_v12  ;;  %vm4160_vm13 = vcmp.eq.s32.totalorder %v548_v11, %v4030_v24  ;;  %v4165_v14 = vadd.s32 80, %v4028_v20  ;;  %v4943_v36 = vmov 0 }
  0x5b   :  { %3278 = vmatpush3.bf16.msra.mxu1 %v3666_v16  ;;  %3257 = vmatprep.subr.bf16.mxu0 %v3667_v17  ;;  %vm4887_vm11 = vmpackc.low %vm4131_vm10, %vm4126_vm9  ;;  %v4934_v13 = vsel %vm4160_vm13, 4294967295, %v4933_v13  ;;  %v562_v17 = vand.u32 15, %v4168_v15 }
  0x5c   :  { %3279 = vmatprep.subr.bf16.mxu1 %v3668_v18  ;;  %433 = vmatprep.mubr.bf16.mxu1 %v103_v54  ;;  %vm4888_vm14 = vmpackc.low %vm4160_vm13, %vm4155_vm12  ;;  %v555_v16 = vand.u32 15, %v4165_v14  ;;  %v4935_v18 = vmov 0  ;;  %vm4906_vm12 = vcmask 785408   ;;  %vm4907_vm13 = vcmask 916480  }
  0x5e   :  { %3258 = vmatpush3.bf16.msra.mxu0 %v3669_v19  ;;  %vm4184_vm15 = vcmp.eq.s32.totalorder %v555_v16, %v4030_v24  ;;  %v4937_v19 = vmov 0 }
  0x5f   :  { %3280 = vmatpush3.bf16.msra.mxu1 %v3670_v21  ;;  %3259 = vmatprep.subr.bf16.mxu0 %v3671_v22  ;;  %v4936_v18 = vsel %vm4184_vm15, 4294967295, %v4935_v18  ;;  %v4194_v21 = vadd.s32 96, %v4028_v20  ;;  %v4197_v22 = vadd.s32 104, %v4028_v20 }
  0x60   :  { %3281 = vmatprep.subr.bf16.mxu1 %v3672_v23 }
  0x61   :  { %v569_v23 = vand.u32 15, %v4194_v21 }
  0x62   :  { %3260 = vmatpush3.bf16.msra.mxu0 %v3673_v25  ;;  %v576_v25 = vand.u32 15, %v4197_v22 }
  0x63   :  { %3282 = vmatpush3.bf16.msra.mxu1 %v3674_v27  ;;  %3261 = vmatprep.subr.bf16.mxu0 %v3675_v29  ;;  %v4212_v27 = vadd.s32 112, %v4028_v20  ;;  %v4215_v29 = vadd.s32 120, %v4028_v20 }
  0x64   :  { %3283 = vmatprep.subr.bf16.mxu1 %v3676_v31  ;;  %v4939_v31 = vmov 0 }
  0x65   :  { %v590_v34 = vand.u32 15, %v4215_v29 }
  0x66   :  { %3262 = vmatpush3.bf16.msra.mxu0 %v3677_v33  ;;  %v583_v33 = vand.u32 15, %v4212_v27 }
  0x67   :  { %3284 = vmatpush3.bf16.msra.mxu1 %v3678_v35  ;;  %3263 = vmatprep.subr.bf16.mxu0 %v3679_v37  ;;  %v3900_v35 = vmov 0.0   ;;  %v4945_v37 = vmov 0 }
  0x68   :  { %3285 = vmatprep.subr.bf16.mxu1 %v3680_v39 }
  0x6a   :  { %3264 = vmatpush3.bf16.msra.mxu0 %v3681_v40 }
  0x6b   :  { %3286 = vmatpush3.bf16.msra.mxu1 %v3682_v41  ;;  %3518 = vmatprep.subr.bf16.mxu0 %v3897_v53 }
  0x6d   :  { %393 = vmatmul.mubr.bf16.vlgmr.msra.gmra.mrb[0].mxu0 %v100_v55 }
  0x6e   :  { %434 = vmatmul.mubr.bf16.vlgmr.msra.gmra.mrb[0].mxu1 %v102_v58  ;;  %3520 = vmatpush3.bf16.msk.msra.mxu0 %vm4892_vm4, %v3898_v59 }
  0x6f   :  { %3521 = vmatprep.subr.bf16.mxu0 %v3897_v53 }
  0x72   :  { %3523 = vmatpush3.bf16.msk.msra.mxu0 %vm4890_vm5, %v3898_v59  ;;  %vm4224_vm5 = vcmp.eq.s32.totalorder %v576_v25, %v4030_v24 }
  0x73   :  { %3524 = vmatprep.subr.bf16.mxu0 %v3897_v53  ;;  %v4942_v32 = vsel %vm4224_vm5, 4294967295, %v4941_v32 }
  0x76   :  { %3526 = vmatpush3.bf16.msk.msra.mxu0 %vm4889_vm8, %v3898_v59  ;;  %vm4219_vm8 = vcmp.eq.s32.totalorder %v569_v23, %v4030_v24 }
  0x77   :  { %3527 = vmatprep.subr.bf16.mxu0 %v3897_v53  ;;  %v4940_v31 = vsel %vm4219_vm8, 4294967295, %v4939_v31  ;;  %vm4898_vm4 = vmpackc.low %vm4224_vm5, %vm4219_vm8  ;;  %vm4909_vm8 = vcmask 523264   ;;  %vm4908_vm5 = vcmask 654336  }
  0x7a   :  { %3529 = vmatpush3.bf16.msk.msra.mxu0 %vm4887_vm11, %v3898_v59  ;;  %vm4189_vm11 = vcmp.eq.s32.totalorder %v562_v17, %v4030_v24 }
  0x7b   :  { %3530 = vmatprep.subr.bf16.mxu0 %v3897_v53  ;;  %v4938_v19 = vsel %vm4189_vm11, 4294967295, %v4937_v19 }
  0x7e   :  { %3532 = vmatpush3.bf16.msk.msra.mxu0 %vm4888_vm14, %v3898_v59  ;;  %vm4891_vm14 = vmpackc.low %vm4189_vm11, %vm4184_vm15  ;;  %vm4243_vm15 = vcmp.eq.s32.totalorder %v583_v33, %v4030_v24  ;;  %vm4248_vm11 = vcmp.eq.s32.totalorder %v590_v34, %v4030_v24 }
  0x7f   :  { %3533 = vmatprep.subr.bf16.mxu0 %v3897_v53  ;;  %v4944_v36 = vsel %vm4243_vm15, 4294967295, %v4943_v36  ;;  %v4946_v37 = vsel %vm4248_vm11, 4294967295, %v4945_v37 }
  0x82   :  { %3535 = vmatpush3.bf16.msk.msra.mxu0 %vm4891_vm14, %v3898_v59  ;;  %vm4895_vm14 = vmmov 0  }
  0x83   :  { %3536 = vmatprep.subr.bf16.mxu0 %v3897_v53  ;;  %3460 = vmatprep.mubr.msk.f32.mxu0 %vm4895_vm14, %v3900_v35  ;;  %vm4897_vm14 = vmpackc.low %vm4248_vm11, %vm4243_vm15  ;;  %vm4911_vm15 = vcmask 261120   ;;  %vm4910_vm11 = vcmask 392192  }
  0x86   :  { %3538 = vmatpush3.bf16.msk.msra.mxu0 %vm4898_vm4, %v3898_v59  ;;  %vm4947_vm4 = vmmov 0  }
  0x87   :  { %3539 = vmatprep.subr.bf16.mxu0 %v3897_v53 }
  0x8a   :  { %3541 = vmatpush3.bf16.msk.msra.mxu0 %vm4897_vm14, %v3898_v59  ;;  %vm4899_vm14 = vcmask 1040384  }
  0x8b   :  { %3463 = vmatprep.subr.bf16.mxu0 %v3900_v35 }
 0x140   :  { %v3265_v38 = vpop.f32.mrb[0].mxu0 }
 0x141   :  { %v3287_v39 = vpop.f32.mrb[0].mxu1  ;;  %v3266_v40 = vpop.f32.mrb[1].mxu0 }
 0x142   :  { %v3267_v41 = vadd.f32 %v3266_v40, %v3265_v38  ;;  %v3288_v44 = vpop.f32.mrb[1].mxu1  ;;  %v3268_v45 = vpop.f32.mrb[2].mxu0 }
 0x143   :  { %v3289_v46 = vadd.f32 %v3288_v44, %v3287_v39  ;;  %v3290_v49 = vpop.f32.mrb[2].mxu1  ;;  %v3269_v50 = vpop.f32.mrb[3].mxu0  ;;  %v3684_v44 = vld [vmem:[#allocation7] sm:$0xff]  }
 0x144   :  { %v3270_v51 = vadd.f32 %v3269_v50, %v3268_v45  ;;  %v3291_v52 = vpop.f32.mrb[3].mxu1  ;;  %v3685_v45 = vld [vmem:[#allocation7 + $0x80] sm:$0xff]   ;;  %v3687_v50 = vld [vmem:[#allocation7 + $0x8] sm:$0xff]  }
 0x145   :  { %v4264_v54 = vadd.f32 %v3289_v46, %v3267_v41  ;;  %v3292_v55 = vadd.f32 %v3291_v52, %v3290_v49  ;;  %v3683_v41 = vld [vmem:[#allocation7 + $0x40] sm:$0xff]   ;;  %v3686_v46 = vld [vmem:[#allocation7 + $0x48] sm:$0xff]  }
 0x146   :  { %3310 = vmatprep.subr.bf16.mxu1 %v3683_v41  ;;  %v3688_v49 = vld [vmem:[#allocation7 + $0x88] sm:$0xff]   ;;  %v3692_v41 = vld [vmem:[#allocation7 + $0x58] sm:$0xff]  }
 0x147   :  { %v4266_v56 = vadd.f32 %v3292_v55, %v3270_v51  ;;  %v451_v57 = vmul.f32 %v4264_v54, %v4264_v54  ;;  %3311 = vmatpush3.bf16.msra.mxu1 %v3684_v44  ;;  %v443_v44 = vld [vmem:[%s4879_s3] sm:$0x1]  ;;  %s3903_s3 = smov 96  }
 0x148   :  { %3312 = vmatprep.subr.bf16.mxu1 %v3686_v46  ;;  %v3694_v46 = vld [vmem:[#allocation7 + $0x98] sm:$0xff]  }
 0x149   :  { %v444_v58 = vadd.f32 %v4266_v56, %v4264_v54  ;;  %v452_v62 = vmul.f32 %v4266_v56, %v4266_v56 }
 0x14b   :  { %v445_v63 = vrot.slane %v444_v58, 4  ;;  %v453_v4 = vadd.f32 %v452_v62, %v451_v57  ;;  %3313 = vmatpush3.bf16.msra.mxu1 %v3687_v50  ;;  %v4292_v50 = vsub.s32 0, %v4028_v20 }
 0x14d   :  { %v446_v5 = vadd.f32 %v445_v63, %v444_v58  ;;  %v454_v10 = vrot.slane %v453_v4, 4 }
 0x14f   :  { %v447_v11 = vrot.slane %v446_v5, 2  ;;  %v455_v16 = vadd.f32 %v454_v10, %v453_v4  ;;  %v3901_v4 = vmov 1966171168  }
 0x151   :  { %v448_v17 = vadd.f32 %v447_v11, %v446_v5  ;;  %v456_v23 = vrot.slane %v455_v16, 2  ;;  %v801_v5 = vunpack.c.l.s4 %v3901_v4  ;;  %v3699_v4 = vld [vmem:[#allocation7 + $0x28] sm:$0xff]  }
 0x153   :  { %v449_v25 = vrot.slane %v448_v17, 1  ;;  %v457_v33 = vadd.f32 %v456_v23, %v455_v16  ;;  %v802_v10 = vunpack.c.0.s8 %v801_v5  ;;  %v3700_v5 = vld [vmem:[#allocation7 + $0xa8] sm:$0xff]  }
 0x155   :  { %v458_v34 = vrot.slane %v457_v33, 1  ;;  %v450_v38 = vadd.f32 %v449_v25, %v448_v17  ;;  %v4280_v11 = vsub.s32 %v802_v10, %v4028_v20  ;;  %v3689_v25 = vld [vmem:[#allocation7 + $0x50] sm:$0xff]  }
 0x156   :  { %3314 = vmatprep.subr.bf16.mxu1 %v3689_v25  ;;  %v3701_v10 = vld [vmem:[#allocation7 + $0x70] sm:$0xff]   ;;  %v3705_v25 = vld [vmem:[#allocation7 + $0x38] sm:$0xff]  }
 0x157   :  { %v459_v39 = vadd.f32 %v458_v34, %v457_v33  ;;  %v3690_v33 = vld [vmem:[#allocation7 + $0x10] sm:$0xff]  }
 0x158   :  { %v3691_v34 = vld [vmem:[#allocation7 + $0x90] sm:$0xff]   ;;  %3315 = vmatpush3.bf16.msra.mxu1 %v3690_v33  ;;  %v3706_v33 = vld [vmem:[#allocation7 + $0xb8] sm:$0xff]  }
 0x159   :  { %v461_v40 = vsel %vm4899_vm14, %v450_v38, %v459_v39  ;;  %v442_v38 = vld [vmem:[%s4878_s2] sm:$0x1]  ;;  %3316 = vmatprep.subr.bf16.mxu1 %v3692_v41  ;;  %s3902_s2 = smov 48  }
 0x15a   :  { %3461 = vmatmul.mubr.f32.vlgmr.msra.gmra.mrb[4].mxu0 %v461_v40 }
 0x15b   :  { %3479 = vmatprep.mubr.msk.bf16.mxu0 %vm4947_vm4, %v3900_v35  ;;  %3464 = vmatpush3.bf16.msra.mxu0 %v3685_v45  ;;  %v3693_v45 = vld [vmem:[#allocation7 + $0x18] sm:$0xff]  }
 0x15c   :  { %3465 = vmatprep.subr.bf16.mxu0 %v3900_v35  ;;  %3317 = vmatpush3.bf16.msra.mxu1 %v3693_v45 }
 0x15f   :  { %3466 = vmatpush3.bf16.msra.mxu0 %v3688_v49 }
 0x160   :  { %3467 = vmatprep.subr.bf16.mxu0 %v3900_v35 }
 0x163   :  { %3468 = vmatpush3.bf16.msra.mxu0 %v3691_v34 }
 0x164   :  { %3469 = vmatprep.subr.bf16.mxu0 %v3900_v35 }
 0x167   :  { %3470 = vmatpush3.bf16.msra.mxu0 %v3694_v46 }
 0x168   :  { %3471 = vmatprep.subr.bf16.mxu0 %v3900_v35 }
 0x22d   :  { %v787_v51 = vpop.f32.mrb[4].mxu0 }
 0x22e   :  { %v791_v52 = vmul.f32 0.0078125, %v787_v51  ;;  %v3462_v55 = vpop.f32.mrb[5].mxu0 }
 0x22f   :  { %v3695_v55 = vld [vmem:[#allocation7 + $0x60] sm:$0xff]  }
 0x230   :  { %v792_v57 = vmul.f32 %v791_v52, %v791_v52  ;;  %3318 = vmatprep.subr.bf16.mxu1 %v3695_v55 }
 0x232   :  { %v794_v58 = vrot.slane %v792_v57, 7  ;;  %v3696_v57 = vld [vmem:[#allocation7 + $0x20] sm:$0xff]  }
 0x233   :  { %3319 = vmatpush3.bf16.msra.mxu1 %v3696_v57 }
 0x234   :  { %v796_v62 = vsub.f32 %v791_v52, %v794_v58  ;;  %v3697_v58 = vld [vmem:[#allocation7 + $0xa0] sm:$0xff]  }
 0x235   :  { %3472 = vmatpush3.bf16.msra.mxu0 %v3697_v58  ;;  %v4315_v58 = vsub.s32 1, %v4028_v20 }
 0x236   :  { %v797_v63 = vadd.f32 1e-05, %v796_v62  ;;  %3473 = vmatprep.subr.bf16.mxu0 %v3900_v35 }
 0x238   :  { %3755 = vrsqrt.f32 %v797_v63 }
 0x239   :  { %3474 = vmatpush3.bf16.msra.mxu0 %v3700_v5 }
 0x23a   :  { %3475 = vmatprep.subr.bf16.mxu0 %v3900_v35 }
 0x242   :  { %v3756_v16 = vpop.eup %3755 }
 0x243   :  { %v806_v17 = vrot.slane %v3756_v16, %v4280_v11  ;;  %v3702_v16 = vld [vmem:[#allocation7 + $0x30] sm:$0xff]  }
 0x245   :  { %v807_v23 = vcombine.high %v806_v17, %v806_v17  ;;  %v3703_v17 = vld [vmem:[#allocation7 + $0xb0] sm:$0xff]  }
 0x246   :  { %3476 = vmatpush3.bf16.msra.mxu0 %v3703_v17  ;;  %v902_v17 = vand.u32 7, %v4033_v26 }
 0x247   :  { %v814_v39 = vrot.slane %v807_v23, %v4280_v11  ;;  %v3704_v23 = vld [vmem:[#allocation7 + $0x78] sm:$0xff]   ;;  %3477 = vmatprep.subr.bf16.mxu0 %v3900_v35 }
 0x249   :  { %v816_v40 = vmul.f32 %v814_v39, %v442_v38 }
 0x24a   :  { %3478 = vmatpush3.bf16.msra.mxu0 %v3706_v33 }
 0x24b   :  { %v817_v49 = vmul.f32 %v816_v40, %v791_v52  ;;  %v3698_v52 = vld [vmem:[#allocation7 + $0x68] sm:$0xff]  }
 0x24c   :  { %3320 = vmatprep.subr.bf16.mxu1 %v3698_v52 }
 0x24d   :  { %v818_v51 = vsub.f32 %v443_v44, %v817_v49  ;;  %3321 = vmatpush3.bf16.msra.mxu1 %v3699_v4  ;;  %v895_v4 = vand.u32 7, %v4028_v20 }
 0x24e   :  { %3322 = vmatprep.subr.bf16.mxu1 %v3701_v10 }
 0x24f   :  { %v823_v62 = vrot.slane %v818_v51, %v4292_v50 }
 0x251   :  { %v825_v63 = vsel %vm4899_vm14, %v816_v40, %v823_v62  ;;  %3323 = vmatpush3.bf16.msra.mxu1 %v3702_v16  ;;  %vm4912_vm14 = vcmask 130048  }
 0x252   :  { %833 = vrot.lane.b32.xlu1 %v825_v63, %s3902_s2  ;;  %827 = vrot.lane.b32.xlu0 %v825_v63, %s3896_s24 }
 0x253   :  { %3324 = vmatprep.subr.bf16.mxu1 %v3704_v23 }
 0x255   :  { %3325 = vmatpush3.bf16.msra.mxu1 %v3705_v25 }
 0x256   :  { %836 = vrot.lane.b32.xlu1 %v825_v63, %s3888_s23  ;;  %830 = vrot.lane.b32.xlu0 %v825_v63, %s3892_s14 }
 0x257   :  { %3542 = vmatprep.subr.bf16.mxu1 %v3897_v53 }
 0x25a   :  { %842 = vrot.lane.b32.xlu1 %v825_v63, %s3903_s3  ;;  %839 = vrot.lane.b32.xlu0 %v825_v63, %s3904_s12 }
 0x25e   :  { %845 = vrot.lane.b32.xlu0 %v825_v63, %s3905_s13 }
 0x2c4   :  { %v834_v34 = vpop.permute.xlu1 %833  ;;  %v828_v38 = vpop.permute.xlu0 %827 }
 0x2c5   :  { %v849_v39 = vsel %vm4912_vm14, %v825_v63, %v828_v38  ;;  %vm4956_vm14 = vcmask 1040384  }
 0x2c6   :  { %vm4957_vm9 = vmmov %vm4956_vm14 }
 0x2c8   :  { %v837_v40 = vpop.permute.xlu1 %836  ;;  %v831_v41 = vpop.permute.xlu0 %830 }
 0x2c9   :  { %v851_v44 = vsel %vm4911_vm15, %v849_v39, %v831_v41  ;;  %v3707_v39 = vld [vmem:[#allocation8] ss:$16 sps:$4 sm:$0xff]  }
 0x2ca   :  { %v853_v45 = vsel %vm4910_vm11, %v851_v44, %v834_v34  ;;  %vm4336_vm11 = vcmp.ne.s32.totalorder %v895_v4, 7 }
 0x2cb   :  { %v855_v46 = vsel %vm4909_vm8, %v853_v45, %v837_v40  ;;  %vm4332_vm8 = vcmp.ne.s32.totalorder %v902_v17, 7 }
 0x2cc   :  { %v840_v49 = vpop.permute.xlu0 %839  ;;  %v843_v51 = vpop.permute.xlu1 %842  ;;  %vm3066_vm10 = vmpackc.low %vm4332_vm8, %vm4336_vm11  ;;  %vm4970_vm11 = vnez %v4942_v32 }
 0x2cd   :  { %v857_v55 = vsel %vm4908_vm5, %v855_v46, %v840_v49  ;;  %vm884_vm5 = vcmask 1046528  }
 0x2ce   :  { %v859_v57 = vsel %vm4906_vm12, %v857_v55, %v843_v51  ;;  %vm4324_vm12 = vcmp.ne.s32.totalorder %v902_v17, 0 }
 0x2d0   :  { %v846_v62 = vpop.permute.xlu0 %845 }
 0x2d1   :  { %v861_v63 = vsel %vm4907_vm13, %v859_v57, %v846_v62  ;;  %vm4328_vm13 = vcmp.ne.s32.totalorder %v895_v4, 0 }
 0x2d2   :  { %v865_v52 = vrot.slane %v861_v63, %v4292_v50  ;;  %v871_v16 = vrot.slane %v861_v63, %v4315_v58  ;;  %vm3061_vm15 = vmpackc.low %vm4324_vm12, %vm4328_vm13  ;;  %vm4971_vm13 = vnez %v4940_v31 }
 0x2d3   :  { %vm4958_vm12 = vmpackc.low %vm4051_vm1, %vm4046_vm0  ;;  %vm4961_vm1 = vnez %v4930_v7 }
 0x2d4   :  { %v866_v5 = vmul.f32 %v865_v52, %v4264_v54  ;;  %v867_v10 = vmul.f32 %v865_v52, %v4266_v56  ;;  %vm4960_vm0 = vmpackc.low %vm4102_vm7, %vm4097_vm6  ;;  %vm4967_vm6 = vnez %v4938_v19  ;;  %vm4968_vm7 = vnez %v4936_v18  ;;  %v3709_v54 = vld [vmem:[#allocation8 + $0x4] ss:$16 sps:$4 sm:$0xff]   ;;  %v3710_v56 = vld [vmem:[#allocation8 + $0x8] ss:$16 sps:$4 sm:$0xff]  }
 0x2d5   :  { %1560 = vmatprep.subr.bf16.mxu0 %v3709_v54  ;;  %v3745_v54 = vld [vmem:[#allocation8 + $0xc4] ss:$16 sps:$4 sm:$0xff]  }
 0x2d6   :  { %v872_v23 = vadd.f32 %v871_v16, %v866_v5  ;;  %v873_v25 = vadd.f32 %v871_v16, %v867_v10 }
 0x2d8   :  { %v874_v33 = vmax.f32 %v872_v23, 0.0  ;;  %v875_v34 = vmax.f32 %v873_v25, 0.0 }
 0x2da   :  { %v878_v40 = vrot.slane %v874_v33, 7  ;;  %v879_v41 = vrot.slane %v875_v34, 7  ;;  %v885_v44 = vrot.slane %v874_v33, 1  ;;  %v886_v45 = vrot.slane %v875_v34, 1 }
 0x2db   :  { %v924_v46 = vpack.c.bf16 %v875_v34, %v874_v33 }
 0x2dc   :  { %v883_v49 = vsel %vm4956_vm14, 0.0, %v878_v40  ;;  %v890_v51 = vsel %vm884_vm5, %v886_v45, 0.0  ;;  %v880_v55 = vsel %vm4957_vm9, %v878_v40, %v879_v41  ;;  %v887_v57 = vsel %vm884_vm5, %v885_v44, %v886_v45  ;;  %vm4959_vm5 = vmpackc.low %vm4061_vm3, %vm4056_vm2  ;;  %v3712_v40 = vld [vmem:[#allocation8 + $0xc] ss:$16 sps:$4 sm:$0xff]   ;;  %v3715_v41 = vld [vmem:[#allocation8 + $0x24] ss:$16 sps:$4 sm:$0xff]  }
 0x2dd   :  { %1150 = vmatprep.mubr.bf16.mxu1 %v924_v46  ;;  %v3062_v62 = vpack.c.bf16 %v880_v55, %v883_v49  ;;  %v3067_v63 = vpack.c.bf16 %v890_v51, %v887_v57  ;;  %vm4964_vm2 = vnez %v4934_v13  ;;  %vm4965_vm3 = vnez %v4932_v12  ;;  %vm4972_vm14 = vmpackc.low %vm4970_vm11, %vm4971_vm13  ;;  %v3718_v44 = vld [vmem:[#allocation8 + $0x2c] ss:$16 sps:$4 sm:$0xff]   ;;  %v3713_v45 = vld [vmem:[#allocation8 + $0x20] ss:$16 sps:$4 sm:$0xff]  }
 0x2de   :  { %vm4966_vm9 = vmpackc.low %vm4964_vm2, %vm4965_vm3  ;;  %v3716_v46 = vld [vmem:[#allocation8 + $0x28] ss:$16 sps:$4 sm:$0xff]   ;;  %v3721_v49 = vld [vmem:[#allocation8 + $0x44] ss:$16 sps:$4 sm:$0xff]   ;;  %vm4980_vm11 = vcmask 392192   ;;  %vm4981_vm13 = vcmask 523264  }
 0x2df   :  { %3063 = vmatmul.mubr.msk.bf16.vlgmr.msra.gmra.mrb[4].mxu1 %vm3061_vm15, %v3062_v62  ;;  %3480 = vmatmul.mubr.msk.bf16.vlgmr.msra.gmra.mrb[8].mxu0 %vm3066_vm10, %v3067_v63  ;;  %vm4969_vm10 = vmpackc.low %vm4967_vm6, %vm4968_vm7  ;;  %vm4973_vm15 = vnez %v4946_v37  ;;  %v3724_v51 = vld [vmem:[#allocation8 + $0x4c] ss:$16 sps:$4 sm:$0xff]   ;;  %v3719_v55 = vld [vmem:[#allocation8 + $0x40] ss:$16 sps:$4 sm:$0xff]   ;;  %vm4978_vm7 = vcmask 130048  }
 0x2e0   :  { %3544 = vmatpush3.bf16.msk.msra.mxu1 %vm4958_vm12, %v3898_v59  ;;  %3515 = vmatprep.mubr.msk.f32.mxu1 %vm4947_vm4, %v3900_v35  ;;  %vm4962_vm4 = vnez %v4928_v6  ;;  %vm4974_vm12 = vnez %v4944_v36  ;;  %v3722_v57 = vld [vmem:[#allocation8 + $0x48] ss:$16 sps:$4 sm:$0xff]  }
 0x2e1   :  { %3545 = vmatprep.subr.bf16.mxu1 %v3897_v53  ;;  %vm4963_vm8 = vmpackc.low %vm4961_vm1, %vm4962_vm4  ;;  %1561 = vmatpush1.bf16.msra.mxu0 %v3707_v39 }
 0x2e2   :  { %1562 = vmatprep.subr.bf16.mxu0 %v3715_v41  ;;  %v3746_v41 = vld [vmem:[#allocation8 + $0xc8] ss:$16 sps:$4 sm:$0xff]  }
 0x2e4   :  { %3547 = vmatpush3.bf16.msk.msra.mxu1 %vm4959_vm5, %v3898_v59  ;;  %vm4975_vm5 = vmpackc.low %vm4973_vm15, %vm4974_vm12 }
 0x2e5   :  { %3548 = vmatprep.subr.bf16.mxu1 %v3897_v53  ;;  %1563 = vmatpush1.bf16.msra.mxu0 %v3713_v45  ;;  %v3754_v45 = vld [vmem:[#allocation8 + $0xec] ss:$16 sps:$4 sm:$0xff]  }
 0x2e6   :  { %1564 = vmatprep.subr.bf16.mxu0 %v3721_v49  ;;  %v3752_v49 = vld [vmem:[#allocation8 + $0xe8] ss:$16 sps:$4 sm:$0xff]  }
 0x2e8   :  { %3550 = vmatpush3.bf16.msk.msra.mxu1 %vm4960_vm0, %v3898_v59  ;;  %vm4976_vm0 = vcmask 1040384  }
 0x2e9   :  { %3551 = vmatprep.subr.bf16.mxu1 %v3897_v53  ;;  %1565 = vmatpush1.bf16.msra.mxu0 %v3719_v55  ;;  %vm4977_vm1 = vmmov %vm4976_vm0  ;;  %v1716_v55 = vadd.s32 128, %v4028_v20 }
 0x2ec   :  { %3553 = vmatpush3.bf16.msk.msra.mxu1 %vm4963_vm8, %v3898_v59 }
 0x2ed   :  { %3554 = vmatprep.subr.bf16.mxu1 %v3897_v53 }
 0x2f0   :  { %3556 = vmatpush3.bf16.msk.msra.mxu1 %vm4966_vm9, %v3898_v59 }
 0x2f1   :  { %3557 = vmatprep.subr.bf16.mxu1 %v3897_v53 }
 0x2f4   :  { %3559 = vmatpush3.bf16.msk.msra.mxu1 %vm4969_vm10, %v3898_v59  ;;  %vm4979_vm10 = vcmask 261120  }
 0x2f5   :  { %3560 = vmatprep.subr.bf16.mxu1 %v3897_v53 }
 0x2f8   :  { %3562 = vmatpush3.bf16.msk.msra.mxu1 %vm4972_vm14, %v3898_v59  ;;  %vm4982_vm14 = vcmask 654336  }
 0x2f9   :  { %3563 = vmatprep.subr.bf16.mxu1 %v3897_v53 }
 0x2fc   :  { %3565 = vmatpush3.bf16.msk.msra.mxu1 %vm4975_vm5, %v3898_v59  ;;  %vm4987_vm5 = vcmask 785408  }
 0x2fd   :  { %1603 = vmatprep.subr.bf16.mxu1 %v3712_v40  ;;  %v3743_v40 = vld [vmem:[#allocation8 + $0xc0] ss:$16 sps:$4 sm:$0xff]  }
 0x3b2   :  { %v3326_v42 = vpop.f32.mrb[4].mxu1  ;;  %v1193_v43 = vpop.f32.mrb[8].mxu0 }
 0x3b3   :  { %v3327_v47 = vpop.f32.mrb[5].mxu1  ;;  %v3481_v48 = vpop.f32.mrb[9].mxu0 }
 0x3b4   :  { %v3328_v0 = vadd.f32 %v3327_v47, %v3326_v42  ;;  %v3329_v1 = vpop.f32.mrb[6].mxu1  ;;  %v1196_v6 = vpop.f32.mrb[10].mxu0 }
 0x3b5   :  { %v3330_v7 = vpop.f32.mrb[7].mxu1  ;;  %v3482_v12 = vpop.f32.mrb[11].mxu0 }
 0x3b6   :  { %v4407_v13 = vadd.f32 %v3328_v0, %v1193_v43  ;;  %v3331_v18 = vadd.f32 %v3330_v7, %v3329_v1  ;;  %v3725_v12 = vld [vmem:[#allocation8 + $0x60] ss:$16 sps:$4 sm:$0xff]  }
 0x3b8   :  { %v4409_v53 = vadd.f32 %v3331_v18, %v1196_v6  ;;  %v1209_v19 = vmul.f32 %v4407_v13, %v4407_v13  ;;  %v3727_v18 = vld [vmem:[#allocation8 + $0x64] ss:$16 sps:$4 sm:$0xff]  }
 0x3b9   :  { %1566 = vmatprep.subr.bf16.mxu0 %v3727_v18 }
 0x3ba   :  { %v1202_v31 = vadd.f32 %v4409_v53, %v4407_v13  ;;  %v1210_v32 = vmul.f32 %v4409_v53, %v4409_v53  ;;  %1567 = vmatpush1.bf16.msra.mxu0 %v3725_v12 }
 0x3bc   :  { %v1203_v35 = vrot.slane %v1202_v31, 4  ;;  %v1211_v36 = vadd.f32 %v1210_v32, %v1209_v19  ;;  %v3728_v19 = vld [vmem:[#allocation8 + $0x68] ss:$16 sps:$4 sm:$0xff]   ;;  %v3730_v32 = vld [vmem:[#allocation8 + $0x6c] ss:$16 sps:$4 sm:$0xff]  }
 0x3be   :  { %v1204_v37 = vadd.f32 %v1203_v35, %v1202_v31  ;;  %v1212_v52 = vrot.slane %v1211_v36, 4  ;;  %v1200_v31 = vld [vmem:[%s4881_s5] sm:$0x1] }
 0x3c0   :  { %v1205_v4 = vrot.slane %v1204_v37, 2  ;;  %v1213_v5 = vadd.f32 %v1212_v52, %v1211_v36  ;;  %v3733_v52 = vld [vmem:[#allocation8 + $0x84] ss:$16 sps:$4 sm:$0xff]  }
 0x3c1   :  { %1568 = vmatprep.subr.bf16.mxu0 %v3733_v52 }
 0x3c2   :  { %v1206_v10 = vadd.f32 %v1205_v4, %v1204_v37  ;;  %v1214_v16 = vrot.slane %v1213_v5, 2  ;;  %v3731_v37 = vld [vmem:[#allocation8 + $0x80] ss:$16 sps:$4 sm:$0xff]   ;;  %v3734_v4 = vld [vmem:[#allocation8 + $0x88] ss:$16 sps:$4 sm:$0xff]  }
 0x3c3   :  { %1569 = vmatpush1.bf16.msra.mxu0 %v3731_v37 }
 0x3c4   :  { %v1207_v17 = vrot.slane %v1206_v10, 1  ;;  %v1215_v23 = vadd.f32 %v1214_v16, %v1213_v5  ;;  %v1201_v5 = vld [vmem:[%s4882_s6] sm:$0x1] }
 0x3c6   :  { %v1216_v25 = vrot.slane %v1215_v23, 1  ;;  %v1208_v33 = vadd.f32 %v1207_v17, %v1206_v10  ;;  %v3736_v10 = vld [vmem:[#allocation8 + $0x8c] ss:$16 sps:$4 sm:$0xff]  }
 0x3c8   :  { %v1217_v34 = vadd.f32 %v1216_v25, %v1215_v23  ;;  %v3737_v23 = vld [vmem:[#allocation8 + $0xa0] ss:$16 sps:$4 sm:$0xff]   ;;  %v3739_v25 = vld [vmem:[#allocation8 + $0xa4] ss:$16 sps:$4 sm:$0xff]  }
 0x3c9   :  { %1570 = vmatprep.subr.bf16.mxu0 %v3739_v25  ;;  %v1750_v25 = vadd.s32 400, %v4028_v20 }
 0x3ca   :  { %v1218_v38 = vsel %vm4976_vm0, %v1208_v33, %v1217_v34  ;;  %v3740_v33 = vld [vmem:[#allocation8 + $0xa8] ss:$16 sps:$4 sm:$0xff]   ;;  %v3742_v34 = vld [vmem:[#allocation8 + $0xac] ss:$16 sps:$4 sm:$0xff]   ;;  %1571 = vmatpush1.bf16.msra.mxu0 %v3737_v23  ;;  %v1719_v23 = vadd.s32 152, %v4028_v20 }
 0x3cb   :  { %3516 = vmatmul.mubr.f32.vlgmr.msra.gmra.mrb[8].mxu1 %v1218_v38  ;;  %1572 = vmatprep.subr.bf16.mxu0 %v3745_v54  ;;  %v1754_v54 = vadd.s32 432, %v4028_v20 }
 0x3cc   :  { %1604 = vmatpush1.bf16.msra.mxu1 %v3710_v56  ;;  %v3748_v56 = vld [vmem:[#allocation8 + $0xcc] ss:$16 sps:$4 sm:$0xff]  }
 0x3cd   :  { %1605 = vmatprep.subr.bf16.mxu1 %v3718_v44  ;;  %v3751_v44 = vld [vmem:[#allocation8 + $0xe4] ss:$16 sps:$4 sm:$0xff]  }
 0x3ce   :  { %1573 = vmatpush1.bf16.msra.mxu0 %v3743_v40 }
 0x3cf   :  { %1574 = vmatprep.subr.bf16.mxu0 %v3751_v44  ;;  %v1901_v44 = vand.u32 63, %v1719_v23 }
 0x3d0   :  { %1606 = vmatpush1.bf16.msra.mxu1 %v3716_v46  ;;  %v3749_v46 = vld [vmem:[#allocation8 + $0xe0] ss:$16 sps:$4 sm:$0xff]  }
 0x3d1   :  { %1607 = vmatprep.subr.bf16.mxu1 %v3724_v51  ;;  %v3906_v51 = vmov 0  }
 0x3d2   :  { %1575 = vmatpush1.bf16.msra.mxu0 %v3749_v46  ;;  %1592 = vmatprep.mubr.bf16.mxu0 %v3906_v51  ;;  %v1735_v46 = vadd.s32 280, %v4028_v20 }
 0x3d3   :  { %1635 = vmatprep.mubr.bf16.mxu1 %v3906_v51  ;;  %v2118_v51 = vand.u32 63, %v1750_v25  ;;  %v1796_v25 = vand.u32 63, %v4089_v60  ;;  %v1728_v60 = vadd.s32 224, %v4028_v20 }
 0x3d4   :  { %1608 = vmatpush1.bf16.msra.mxu1 %v3722_v57  ;;  %v1717_v57 = vadd.s32 136, %v4028_v20 }
 0x3d5   :  { %1609 = vmatprep.subr.bf16.mxu1 %v3730_v32 }
 0x3d8   :  { %1610 = vmatpush1.bf16.msra.mxu1 %v3728_v19  ;;  %v1732_v19 = vadd.s32 256, %v4028_v20 }
 0x3d9   :  { %1611 = vmatprep.subr.bf16.mxu1 %v3736_v10  ;;  %v1718_v10 = vadd.s32 144, %v4028_v20 }
 0x3db   :  { %v1894_v40 = vand.u32 63, %v1718_v10  ;;  %v1838_v10 = vand.u32 63, %v4165_v14 }
 0x3dc   :  { %1612 = vmatpush1.bf16.msra.mxu1 %v3734_v4  ;;  %v1992_v4 = vand.u32 63, %v1732_v19 }
 0x3dd   :  { %1613 = vmatprep.subr.bf16.mxu1 %v3742_v34  ;;  %v1722_v34 = vadd.s32 176, %v4028_v20 }
 0x3de   :  { %vm4470_vm0 = vcmp.eq.s32.totalorder %v1992_v4, %v4030_v24 }
 0x3e0   :  { %1614 = vmatpush1.bf16.msra.mxu1 %v3740_v33  ;;  %v1751_v33 = vadd.s32 408, %v4028_v20 }
 0x3e1   :  { %1615 = vmatprep.subr.bf16.mxu1 %v3748_v56  ;;  %v1755_v56 = vadd.s32 440, %v4028_v20 }
 0x3e4   :  { %1616 = vmatpush1.bf16.msra.mxu1 %v3746_v41 }
 0x3e5   :  { %1617 = vmatprep.subr.bf16.mxu1 %v3754_v45  ;;  %v1734_v45 = vadd.s32 272, %v4028_v20 }
 0x3e8   :  { %1618 = vmatpush1.bf16.msra.mxu1 %v3752_v49 }
 0x49e   :  { %v1285_v62 = vpop.f32.mrb[8].mxu1 }
 0x49f   :  { %v1289_v63 = vmul.f32 0.0078125, %v1285_v62  ;;  %v3517_v42 = vpop.f32.mrb[9].mxu1  ;;  %v1748_v62 = vadd.s32 384, %v4028_v20 }
 0x4a0   :  { %v1880_v42 = vand.u32 63, %v1716_v55  ;;  %v2125_v55 = vand.u32 63, %v1751_v33  ;;  %v1803_v33 = vand.u32 63, %v4092_v61  ;;  %v5015_v61 = vmov 0 }
 0x4a1   :  { %v1290_v43 = vmul.f32 %v1289_v63, %v1289_v63 }
 0x4a2   :  { %vm2548_vm4 = vcmp.eq.s32.totalorder %v1880_v42, %v4030_v24  ;;  %v1721_v42 = vadd.s32 168, %v4028_v20 }
 0x4a3   :  { %v1292_v47 = vrot.slane %v1290_v43, 7  ;;  %v1887_v43 = vand.u32 63, %v1717_v57  ;;  %v1782_v57 = vand.u32 63, %v4036_v28  ;;  %v1824_v28 = vand.u32 63, %v4136_v8 }
 0x4a5   :  { %v1294_v48 = vsub.f32 %v1289_v63, %v1292_v47  ;;  %v2104_v47 = vand.u32 63, %v1748_v62  ;;  %vm2549_vm8 = vcmp.eq.s32.totalorder %v1887_v43, %v4030_v24  ;;  %v1789_v62 = vand.u32 63, %v4039_v30 }
 0x4a6   :  { %vm3566_vm9 = vmpackc.low %vm2549_vm8, %vm2548_vm4  ;;  %vm4992_vm4 = vcmask 916480   ;;  %v1752_v43 = vadd.s32 416, %v4028_v20  ;;  %vm4493_vm8 = vcmp.eq.s32.totalorder %v1894_v40, %v4030_v24  ;;  %v2006_v30 = vand.u32 63, %v1734_v45 }
 0x4a7   :  { %v1295_v0 = vadd.f32 1e-05, %v1294_v48  ;;  %vm2580_vm2 = vcmp.eq.s32.totalorder %v2104_v47, %v4030_v24  ;;  %3567 = vmatprep.subr.msk.bf16.mxu0 %vm3566_vm9, %v3898_v59  ;;  %vm4508_vm9 = vcmp.eq.s32.totalorder %v2125_v55, %v4030_v24  ;;  %v1739_v45 = vadd.s32 312, %v4028_v20 }
 0x4a8   :  { %v2153_v55 = vand.u32 63, %v1755_v56 }
 0x4a9   :  { %3757 = vrsqrt.f32 %v1295_v0 }
 0x4b3   :  { %v3758_v1 = vpop.eup %3757 }
 0x4b4   :  { %v1304_v6 = vrot.slane %v3758_v1, %v4280_v11 }
 0x4b6   :  { %v1305_v7 = vcombine.high %v1304_v6, %v1304_v6 }
 0x4b8   :  { %v1312_v35 = vrot.slane %v1305_v7, %v4280_v11 }
 0x4ba   :  { %v1314_v36 = vmul.f32 %v1312_v35, %v1200_v31  ;;  %v1733_v31 = vadd.s32 264, %v4028_v20  ;;  %v1768_v35 = vand.u32 63, %v4028_v20 }
 0x4bc   :  { %v1315_v16 = vmul.f32 %v1314_v36, %v1289_v63  ;;  %v1749_v63 = vadd.s32 392, %v4028_v20  ;;  %vm4459_vm15 = vcmp.eq.s32.totalorder %v1768_v35, %v4030_v24  ;;  %v1737_v35 = vadd.s32 296, %v4028_v20 }
 0x4be   :  { %v1316_v17 = vsub.f32 %v1201_v5, %v1315_v16  ;;  %v2111_v48 = vand.u32 63, %v1749_v63  ;;  %v1999_v5 = vand.u32 63, %v1733_v31  ;;  %v1720_v63 = vadd.s32 160, %v4028_v20 }
 0x4bf   :  { %v1915_v31 = vand.u32 63, %v1721_v42  ;;  %v2041_v42 = vand.u32 63, %v1739_v45  ;;  %v1859_v45 = vand.u32 63, %v4197_v22 }
 0x4c0   :  { %v1321_v38 = vrot.slane %v1316_v17, %v4292_v50  ;;  %vm2581_vm3 = vcmp.eq.s32.totalorder %v2111_v48, %v4030_v24  ;;  %v1908_v19 = vand.u32 63, %v1720_v63 }
 0x4c1   :  { %vm3598_vm6 = vmpackc.low %vm2581_vm3, %vm2580_vm2  ;;  %vm4498_vm2 = vcmp.eq.s32.totalorder %v1901_v44, %v4030_v24  ;;  %vm4503_vm3 = vcmp.eq.s32.totalorder %v2118_v51, %v4030_v24  ;;  %v1738_v44 = vadd.s32 304, %v4028_v20  ;;  %v2146_v51 = vand.u32 63, %v1754_v54 }
 0x4c2   :  { %v1323_v39 = vsel %vm4977_vm1, %v1314_v36, %v1321_v38  ;;  %3599 = vmatprep.subr.msk.bf16.mxu1 %vm3598_vm6, %v3898_v59  ;;  %v1775_v36 = vand.u32 63, %v4033_v26  ;;  %vm4475_vm1 = vcmp.eq.s32.totalorder %v1999_v5, %v4030_v24  ;;  %v1723_v26 = vadd.s32 184, %v4028_v20 }
 0x4c3   :  { %1328 = vrot.lane.b32.xlu0 %v1323_v39, %s3892_s14  ;;  %1325 = vrot.lane.b32.xlu1 %v1323_v39, %s3896_s24  ;;  %v2034_v63 = vand.u32 63, %v1738_v44  ;;  %v1759_v5 = vadd.s32 472, %v4028_v20  ;;  %v1964_v54 = vand.u32 63, %v1728_v60  ;;  %v1852_v44 = vand.u32 63, %v4194_v21 }
 0x4c4   :  { %vm4464_vm12 = vcmp.eq.s32.totalorder %v1775_v36, %v4030_v24 }
 0x4c7   :  { %1334 = vrot.lane.b32.xlu0 %v1323_v39, %s3888_s23  ;;  %1331 = vrot.lane.b32.xlu1 %v1323_v39, %s3902_s2 }
 0x4cb   :  { %1340 = vrot.lane.b32.xlu0 %v1323_v39, %s3903_s3  ;;  %1337 = vrot.lane.b32.xlu1 %v1323_v39, %s3904_s12 }
 0x4cf   :  { %1343 = vrot.lane.b32.xlu1 %v1323_v39, %s3905_s13 }
 0x535   :  { %v1329_v0 = vpop.permute.xlu0 %1328  ;;  %v1326_v1 = vpop.permute.xlu1 %1325 }
 0x536   :  { %v1346_v6 = vsel %vm4978_vm7, %v1323_v39, %v1326_v1  ;;  %v1753_v1 = vadd.s32 424, %v4028_v20  ;;  %vm4553_vm7 = vcmp.eq.s32.totalorder %v1908_v19, %v4030_v24 }
 0x537   :  { %v1347_v12 = vsel %vm4979_vm10, %v1346_v6, %v1329_v0  ;;  %vm4523_vm10 = vcmp.eq.s32.totalorder %v1782_v57, %v4030_v24  ;;  %v1810_v57 = vand.u32 63, %v4107_v2  ;;  %v1757_v6 = vadd.s32 456, %v4028_v20 }
 0x538   :  { %v2139_v4 = vand.u32 63, %v1753_v1  ;;  %v1756_v1 = vadd.s32 448, %v4028_v20  ;;  %v1763_v2 = vadd.s32 504, %v4028_v20 }
 0x539   :  { %v1335_v7 = vpop.permute.xlu0 %1334  ;;  %v1332_v18 = vpop.permute.xlu1 %1331  ;;  %v2167_v19 = vand.u32 63, %v1757_v6 }
 0x53a   :  { %v1348_v32 = vsel %vm4980_vm11, %v1347_v12, %v1332_v18  ;;  %vm4528_vm11 = vcmp.eq.s32.totalorder %v1789_v62, %v4030_v24  ;;  %v1817_v62 = vand.u32 63, %v4110_v3  ;;  %v2160_v18 = vand.u32 63, %v1756_v1 }
 0x53b   :  { %v1349_v37 = vsel %vm4981_vm13, %v1348_v32, %v1335_v7  ;;  %v2013_v7 = vand.u32 63, %v1735_v46  ;;  %v1736_v32 = vadd.s32 288, %v4028_v20  ;;  %vm4533_vm13 = vcmp.eq.s32.totalorder %v2006_v30, %v4030_v24  ;;  %vm3572_vm6 = vmpackc.low %vm4528_vm11, %vm4523_vm10 }
 0x53c   :  { %vm5018_vm10 = vmpackc.low %vm4475_vm1, %vm4470_vm0  ;;  %vm2536_vm0 = vcmp.eq.s32.totalorder %v1796_v25, %v4030_v24  ;;  %vm2537_vm1 = vcmp.eq.s32.totalorder %v1803_v33, %v4030_v24  ;;  %v1922_v46 = vand.u32 63, %v1722_v34  ;;  %v1831_v30 = vand.u32 63, %v4139_v9 }
 0x53d   :  { %v1338_v52 = vpop.permute.xlu1 %1337  ;;  %v1341_v16 = vpop.permute.xlu0 %1340  ;;  %v2020_v40 = vand.u32 63, %v1736_v32  ;;  %v1742_v25 = vadd.s32 336, %v4028_v20  ;;  %v1743_v33 = vadd.s32 344, %v4028_v20  ;;  %v1760_v34 = vadd.s32 480, %v4028_v20 }
 0x53e   :  { %v1350_v17 = vsel %vm4982_vm14, %v1349_v37, %v1338_v52  ;;  %v2132_v52 = vand.u32 63, %v1752_v43  ;;  %vm4558_vm14 = vcmp.eq.s32.totalorder %v1915_v31, %v4030_v24  ;;  %v1762_v43 = vadd.s32 496, %v4028_v20 }
 0x53f   :  { %v1351_v38 = vsel %vm4987_vm5, %v1350_v17, %v1341_v16  ;;  %vm4542_vm5 = vcmp.eq.s32.totalorder %v2013_v7, %v4030_v24  ;;  %v1740_v7 = vadd.s32 320, %v4028_v20  ;;  %v1845_v16 = vand.u32 63, %v4168_v15 }
 0x540   :  { %vm3604_vm11 = vmpackc.low %vm4542_vm5, %vm4533_vm13  ;;  %vm2568_vm5 = vcmp.eq.s32.totalorder %v2020_v40, %v4030_v24  ;;  %v2062_v40 = vand.u32 63, %v1742_v25  ;;  %v1866_v3 = vand.u32 63, %v4212_v27  ;;  %v2202_v1 = vand.u32 63, %v1762_v43 }
 0x541   :  { %v1344_v39 = vpop.permute.xlu1 %1343  ;;  %v2048_v31 = vand.u32 63, %v1740_v7  ;;  %v2209_v6 = vand.u32 63, %v1763_v2  ;;  %v1746_v27 = vadd.s32 368, %v4028_v20 }
 0x542   :  { %v1352_v41 = vsel %vm4992_vm4, %v1351_v38, %v1344_v39  ;;  %vm3602_vm4 = vmpackc.low %vm4508_vm9, %vm4503_vm3  ;;  %v5011_v39 = vmov 0  ;;  %vm4567_vm3 = vcmp.eq.s32.totalorder %v2132_v52, %v4030_v24  ;;  %vm4572_vm9 = vcmp.eq.s32.totalorder %v2139_v4, %v4030_v24 }
 0x543   :  { %v1356_v49 = vrot.slane %v1352_v41, %v4292_v50  ;;  %v1362_v0 = vrot.slane %v1352_v41, %v4315_v58  ;;  %v5012_v39 = vsel %vm4558_vm14, 4294967295, %v5011_v39  ;;  %v2027_v41 = vand.u32 63, %v1737_v35  ;;  %vm5017_vm14 = vmpackc.low %vm4464_vm12, %vm4459_vm15 }
 0x544   :  { %v5016_v61 = vsel %vm4572_vm9, 4294967295, %v5015_v61  ;;  %vm5019_vm9 = vmpackc.low %vm4498_vm2, %vm4493_vm8  ;;  %vm5020_vm15 = vnez %v5012_v39  ;;  %v1727_v52 = vadd.s32 216, %v4028_v20  ;;  %v1758_v4 = vadd.s32 464, %v4028_v20 }
 0x545   :  { %v1357_v47 = vmul.f32 %v1356_v49, %v4407_v13  ;;  %v1358_v48 = vmul.f32 %v1356_v49, %v4409_v53  ;;  %vm3574_vm12 = vmpackc.low %vm5020_vm15, %vm4553_vm7  ;;  %vm5021_vm13 = vnez %v5016_v61  ;;  %vm2569_vm8 = vcmp.eq.s32.totalorder %v2027_v41, %v4030_v24 }
 0x546   :  { %vm3576_vm2 = vmpackc.low %vm2537_vm1, %vm2536_vm0  ;;  %v1929_v49 = vand.u32 63, %v1723_v26  ;;  %vm4635_vm15 = vcmp.eq.s32.totalorder %v1817_v62, %v4030_v24  ;;  %vm4645_vm0 = vcmp.eq.s32.totalorder %v2041_v42, %v4030_v24  ;;  %v1957_v23 = vand.u32 63, %v1727_v52 }
 0x547   :  { %v1363_v12 = vadd.f32 %v1362_v0, %v1357_v47  ;;  %v1364_v13 = vadd.f32 %v1362_v0, %v1358_v48  ;;  %vm3608_vm7 = vmpackc.low %vm2569_vm8, %vm2568_vm5  ;;  %v1724_v48 = vadd.s32 192, %v4028_v20  ;;  %v1725_v0 = vadd.s32 200, %v4028_v20 }
 0x548   :  { %vm4670_vm5 = vcmp.eq.s32.totalorder %v1824_v28, %v4030_v24  ;;  %vm4675_vm8 = vcmp.eq.s32.totalorder %v1831_v30, %v4030_v24  ;;  %v2174_v14 = vand.u32 63, %v1758_v4  ;;  %v2181_v38 = vand.u32 63, %v1759_v5 }
 0x549   :  { %v1365_v36 = vmax.f32 %v1363_v12, 0.0  ;;  %v1366_v37 = vmax.f32 %v1364_v13, 0.0  ;;  %v1741_v12 = vadd.s32 328, %v4028_v20  ;;  %v1936_v13 = vand.u32 63, %v1724_v48 }
 0x54a   :  { %v1943_v53 = vand.u32 63, %v1725_v0  ;;  %v2069_v41 = vand.u32 63, %v1743_v33  ;;  %v1729_v61 = vadd.s32 232, %v4028_v20  ;;  %v1761_v26 = vadd.s32 488, %v4028_v20 }
 0x54b   :  { %v1367_v17 = vpack.c.bf16 %v1366_v37, %v1365_v36  ;;  %v2055_v32 = vand.u32 63, %v1741_v12  ;;  %v1726_v37 = vadd.s32 208, %v4028_v20  ;;  %v1731_v42 = vadd.s32 248, %v4028_v20 }
 0x54c   :  { %v1971_v56 = vand.u32 63, %v1729_v61  ;;  %v1873_v47 = vand.u32 63, %v4215_v29  ;;  %v1747_v29 = vadd.s32 376, %v4028_v20  ;;  %v2090_v30 = vand.u32 63, %v1746_v27 }
 0x54d   :  { %1593 = vmatmul.mubr.bf16.vlgmr.msra.gmra.mrb[12].mxu0 %v1367_v17  ;;  %1636 = vmatmul.mubr.bf16.vlgmr.msra.gmra.mrb[12].mxu1 %v1367_v17  ;;  %v1950_v17 = vand.u32 63, %v1726_v37  ;;  %v1985_v0 = vand.u32 63, %v1731_v42 }
 0x54e   :  { %3569 = vmatpush3.bf16.msk.msra.mxu0 %vm5017_vm14, %v3898_v59  ;;  %3601 = vmatpush3.bf16.msk.msra.mxu1 %vm5018_vm10, %v3898_v59  ;;  %vm3606_vm14 = vmpackc.low %vm5021_vm13, %vm4567_vm3  ;;  %vm2586_vm3 = vcmp.eq.s32.totalorder %v2146_v51, %v4030_v24  ;;  %v1744_v51 = vadd.s32 352, %v4028_v20  ;;  %v2097_v7 = vand.u32 63, %v1747_v29 }
 0x54f   :  { %3571 = vmatprep.subr.msk.bf16.mxu0 %vm5019_vm9, %v3898_v59  ;;  %3603 = vmatprep.subr.msk.bf16.mxu1 %vm3602_vm4, %v3898_v59  ;;  %vm2555_vm4 = vcmp.eq.s32.totalorder %v1929_v49, %v4030_v24  ;;  %vm2587_vm9 = vcmp.eq.s32.totalorder %v2153_v55, %v4030_v24  ;;  %v2195_v49 = vand.u32 63, %v1761_v26  ;;  %v1745_v55 = vadd.s32 360, %v4028_v20 }
 0x550   :  { %vm3610_vm1 = vmpackc.low %vm2587_vm9, %vm2586_vm3  ;;  %v2076_v22 = vand.u32 63, %v1744_v51 }
 0x551   :  { %vm3584_vm3 = vmpackc.low %vm4675_vm8, %vm4670_vm5  ;;  %v2083_v62 = vand.u32 63, %v1745_v55 }
 0x552   :  { %3573 = vmatpush3.bf16.msk.msra.mxu0 %vm3572_vm6, %v3898_v59  ;;  %3605 = vmatpush3.bf16.msk.msra.mxu1 %vm3604_vm11, %v3898_v59  ;;  %vm2554_vm6 = vcmp.eq.s32.totalorder %v1922_v46, %v4030_v24  ;;  %vm4630_vm11 = vcmp.eq.s32.totalorder %v1810_v57, %v4030_v24  ;;  %v2188_v46 = vand.u32 63, %v1760_v34 }
 0x553   :  { %3575 = vmatprep.subr.msk.bf16.mxu0 %vm3574_vm12, %v3898_v59  ;;  %3607 = vmatprep.subr.msk.bf16.mxu1 %vm3606_vm14, %v3898_v59  ;;  %vm3578_vm10 = vmpackc.low %vm2555_vm4, %vm2554_vm6  ;;  %vm4640_vm12 = vcmp.eq.s32.totalorder %v2034_v63, %v4030_v24  ;;  %vm2588_vm6 = vcmp.eq.s32.totalorder %v2160_v18, %v4030_v24  ;;  %vm2589_vm4 = vcmp.eq.s32.totalorder %v2167_v19, %v4030_v24  ;;  %v1730_v63 = vadd.s32 240, %v4028_v20 }
 0x554   :  { %vm3580_vm13 = vmpackc.low %vm4635_vm15, %vm4630_vm11  ;;  %vm4693_vm11 = vcmp.eq.s32.totalorder %v2055_v32, %v4030_v24 }
 0x555   :  { %vm3612_vm14 = vmpackc.low %vm4645_vm0, %vm4640_vm12  ;;  %vm4714_vm0 = vcmp.eq.s32.totalorder %v1838_v10, %v4030_v24  ;;  %v1978_v48 = vand.u32 63, %v1730_v63 }
 0x556   :  { %3577 = vmatpush3.bf16.msk.msra.mxu0 %vm3576_vm2, %v3898_v59  ;;  %3609 = vmatpush3.bf16.msk.msra.mxu1 %vm3608_vm7, %v3898_v59  ;;  %vm2556_vm2 = vcmp.eq.s32.totalorder %v1936_v13, %v4030_v24  ;;  %vm2557_vm7 = vcmp.eq.s32.totalorder %v1943_v53, %v4030_v24  ;;  %vm3614_vm15 = vmpackc.low %vm2589_vm4, %vm2588_vm6  ;;  %vm2574_vm4 = vcmp.eq.s32.totalorder %v2062_v40, %v4030_v24 }
 0x557   :  { %3579 = vmatprep.subr.msk.bf16.mxu0 %vm3578_vm10, %v3898_v59  ;;  %3611 = vmatprep.subr.msk.bf16.mxu1 %vm3610_vm1, %v3898_v59  ;;  %vm3582_vm9 = vmpackc.low %vm2557_vm7, %vm2556_vm2  ;;  %vm4688_vm10 = vcmp.eq.s32.totalorder %v2048_v31, %v4030_v24  ;;  %vm4719_vm1 = vcmp.eq.s32.totalorder %v1845_v16, %v4030_v24  ;;  %vm2590_vm2 = vcmp.eq.s32.totalorder %v2174_v14, %v4030_v24 }
 0x558   :  { %vm3616_vm12 = vmpackc.low %vm4693_vm11, %vm4688_vm10  ;;  %vm2591_vm7 = vcmp.eq.s32.totalorder %v2181_v38, %v4030_v24  ;;  %vm2560_vm10 = vcmp.eq.s32.totalorder %v1964_v54, %v4030_v24  ;;  %vm2561_vm11 = vcmp.eq.s32.totalorder %v1971_v56, %v4030_v24 }
 0x559   :  { %vm3588_vm5 = vmpackc.low %vm4719_vm1, %vm4714_vm0  ;;  %vm2592_vm1 = vcmp.eq.s32.totalorder %v2188_v46, %v4030_v24 }
 0x55a   :  { %3581 = vmatpush3.bf16.msk.msra.mxu0 %vm3580_vm13, %v3898_v59  ;;  %3613 = vmatpush3.bf16.msk.msra.mxu1 %vm3612_vm14, %v3898_v59  ;;  %vm2558_vm13 = vcmp.eq.s32.totalorder %v1950_v17, %v4030_v24  ;;  %vm2559_vm14 = vcmp.eq.s32.totalorder %v1957_v23, %v4030_v24  ;;  %vm3618_vm6 = vmpackc.low %vm2591_vm7, %vm2590_vm2  ;;  %vm2577_vm2 = vcmp.eq.s32.totalorder %v2083_v62, %v4030_v24 }
 0x55b   :  { %3583 = vmatprep.subr.msk.bf16.mxu0 %vm3582_vm9, %v3898_v59  ;;  %3615 = vmatprep.subr.msk.bf16.mxu1 %vm3614_vm15, %v3898_v59  ;;  %vm3586_vm8 = vmpackc.low %vm2559_vm14, %vm2558_vm13  ;;  %vm4748_vm15 = vcmp.eq.s32.totalorder %v1852_v44, %v4030_v24  ;;  %vm2593_vm13 = vcmp.eq.s32.totalorder %v2195_v49, %v4030_v24 }
 0x55c   :  { %vm3590_vm0 = vmpackc.low %vm2561_vm11, %vm2560_vm10  ;;  %vm2594_vm10 = vcmp.eq.s32.totalorder %v2202_v1, %v4030_v24  ;;  %vm2595_vm11 = vcmp.eq.s32.totalorder %v2209_v6, %v4030_v24 }
 0x55d   :  { %vm3622_vm14 = vmpackc.low %vm2593_vm13, %vm2592_vm1  ;;  %vm2578_vm1 = vcmp.eq.s32.totalorder %v2090_v30, %v4030_v24  ;;  %vm2579_vm13 = vcmp.eq.s32.totalorder %v2097_v7, %v4030_v24 }
 0x55e   :  { %3585 = vmatpush3.bf16.msk.msra.mxu0 %vm3584_vm3, %v3898_v59  ;;  %3617 = vmatpush3.bf16.msk.msra.mxu1 %vm3616_vm12, %v3898_v59  ;;  %vm2575_vm3 = vcmp.eq.s32.totalorder %v2069_v41, %v4030_v24  ;;  %vm4753_vm12 = vcmp.eq.s32.totalorder %v1859_v45, %v4030_v24 }
 0x55f   :  { %3587 = vmatprep.subr.msk.bf16.mxu0 %vm3586_vm8, %v3898_v59  ;;  %3619 = vmatprep.subr.msk.bf16.mxu1 %vm3618_vm6, %v3898_v59  ;;  %vm3620_vm9 = vmpackc.low %vm2575_vm3, %vm2574_vm4  ;;  %vm2576_vm8 = vcmp.eq.s32.totalorder %v2076_v22, %v4030_v24  ;;  %vm4776_vm6 = vcmp.eq.s32.totalorder %v1866_v3, %v4030_v24  ;;  %vm2547_vm4 = vcmp.eq.s32.totalorder %v1873_v47, %v4030_v24 }
 0x560   :  { %vm3624_vm7 = vmpackc.low %vm2577_vm2, %vm2576_vm8  ;;  %vm2562_vm3 = vcmp.eq.s32.totalorder %v1978_v48, %v4030_v24 }
 0x562   :  { %3589 = vmatpush3.bf16.msk.msra.mxu0 %vm3588_vm5, %v3898_v59  ;;  %3621 = vmatpush3.bf16.msk.msra.mxu1 %vm3620_vm9, %v3898_v59  ;;  %vm3592_vm5 = vmpackc.low %vm4753_vm12, %vm4748_vm15  ;;  %vm2563_vm9 = vcmp.eq.s32.totalorder %v1985_v0, %v4030_v24 }
 0x563   :  { %3591 = vmatprep.subr.msk.bf16.mxu0 %vm3590_vm0, %v3898_v59  ;;  %3623 = vmatprep.subr.msk.bf16.mxu1 %vm3622_vm14, %v3898_v59  ;;  %vm3596_vm15 = vmpackc.low %vm2547_vm4, %vm4776_vm6  ;;  %vm5053_vm4 = vcmask 523264  }
 0x564   :  { %vm3594_vm12 = vmpackc.low %vm2563_vm9, %vm2562_vm3 }
 0x565   :  { %vm3626_vm0 = vmpackc.low %vm2595_vm11, %vm2594_vm10 }
 0x566   :  { %3593 = vmatpush3.bf16.msk.msra.mxu0 %vm3592_vm5, %v3898_v59  ;;  %3625 = vmatpush3.bf16.msk.msra.mxu1 %vm3624_vm7, %v3898_v59  ;;  %vm3628_vm14 = vmpackc.low %vm2579_vm13, %vm2578_vm1  ;;  %vm5048_vm5 = vcmask 1040384  }
 0x567   :  { %3595 = vmatprep.subr.msk.bf16.mxu0 %vm3594_vm12, %v3898_v59  ;;  %3627 = vmatprep.subr.msk.bf16.mxu1 %vm3626_vm0, %v3898_v59  ;;  %vm5049_vm8 = vmmov %vm5048_vm5 }
 0x568   :  { %vm5050_vm2 = vmmov %vm5048_vm5 }
 0x569   :  { %vm5051_vm7 = vmmov %vm5050_vm2 }
 0x56a   :  { %3597 = vmatpush3.bf16.msk.msra.mxu0 %vm3596_vm15, %v3898_v59  ;;  %3629 = vmatpush3.bf16.msk.msra.mxu1 %vm3628_vm14, %v3898_v59  ;;  %vm5052_vm6 = vmmov %vm5050_vm2 }
 0x620   :  { %v4795_v20 = vpop.f32.mrb[12].mxu0  ;;  %v4797_v12 = vpop.f32.mrb[12].mxu1 }
 0x621   :  { %v4799_v13 = vpop.f32.mrb[13].mxu0  ;;  %v4801_v53 = vpop.f32.mrb[13].mxu1  ;;  %v1676_v18 = vmul.f32 %v4795_v20, %v4795_v20  ;;  %v1678_v19 = vmul.f32 %v4797_v12, %v4797_v12 }
 0x622   :  { %v1677_v24 = vmul.f32 %v4799_v13, %v4799_v13  ;;  %v1679_v59 = vmul.f32 %v4801_v53, %v4801_v53  ;;  %v4811_v8 = vpop.f32.mrb[14].mxu0  ;;  %v4813_v9 = vpop.f32.mrb[14].mxu1 }
 0x623   :  { %v1648_v31 = vadd.f32 %v4811_v8, %v4795_v20  ;;  %v1680_v32 = vmul.f32 %v4811_v8, %v4811_v8  ;;  %v1662_v35 = vadd.f32 %v4813_v9, %v4797_v12  ;;  %v1682_v36 = vmul.f32 %v4813_v9, %v4813_v9  ;;  %v4823_v37 = vpop.f32.mrb[15].mxu0  ;;  %v4825_v52 = vpop.f32.mrb[15].mxu1 }
 0x624   :  { %v1655_v4 = vadd.f32 %v4823_v37, %v4799_v13  ;;  %v1681_v5 = vmul.f32 %v4823_v37, %v4823_v37  ;;  %v1669_v10 = vadd.f32 %v4825_v52, %v4801_v53  ;;  %v1683_v16 = vmul.f32 %v4825_v52, %v4825_v52 }
 0x625   :  { %v1649_v17 = vrot.slane %v1648_v31, 4  ;;  %v1684_v23 = vadd.f32 %v1680_v32, %v1676_v18  ;;  %v1663_v25 = vrot.slane %v1662_v35, 4  ;;  %v1698_v33 = vadd.f32 %v1682_v36, %v1678_v19 }
 0x626   :  { %v1656_v14 = vrot.slane %v1655_v4, 4  ;;  %v1691_v38 = vadd.f32 %v1681_v5, %v1677_v24  ;;  %v1670_v15 = vrot.slane %v1669_v10, 4  ;;  %v1705_v39 = vadd.f32 %v1683_v16, %v1679_v59 }
 0x627   :  { %v1650_v40 = vadd.f32 %v1649_v17, %v1648_v31  ;;  %v1685_v41 = vrot.slane %v1684_v23, 4  ;;  %v1664_v60 = vadd.f32 %v1663_v25, %v1662_v35  ;;  %v1699_v61 = vrot.slane %v1698_v33, 4 }
 0x628   :  { %v1657_v34 = vadd.f32 %v1656_v14, %v1655_v4  ;;  %v1692_v26 = vrot.slane %v1691_v38, 4  ;;  %v1671_v54 = vadd.f32 %v1670_v15, %v1669_v10  ;;  %v1706_v56 = vrot.slane %v1705_v39, 4 }
 0x629   :  { %v1651_v44 = vrot.slane %v1650_v40, 2  ;;  %v1686_v45 = vadd.f32 %v1685_v41, %v1684_v23  ;;  %v1665_v46 = vrot.slane %v1664_v60, 2  ;;  %v1700_v49 = vadd.f32 %v1699_v61, %v1698_v33 }
 0x62a   :  { %v1658_v51 = vrot.slane %v1657_v34, 2  ;;  %v1693_v55 = vadd.f32 %v1692_v26, %v1691_v38  ;;  %v1672_v57 = vrot.slane %v1671_v54, 2  ;;  %v1707_v21 = vadd.f32 %v1706_v56, %v1705_v39 }
 0x62b   :  { %v1652_v22 = vadd.f32 %v1651_v44, %v1650_v40  ;;  %v1687_v62 = vrot.slane %v1686_v45, 2  ;;  %v1666_v63 = vadd.f32 %v1665_v46, %v1664_v60  ;;  %v1701_v42 = vrot.slane %v1700_v49, 2  ;;  %v1646_v46 = vld [vmem:[%s4884_s8] sm:$0x1]  ;;  %s3907_s8 = smov [#allocation10]  }
 0x62c   :  { %v1659_v43 = vadd.f32 %v1658_v51, %v1657_v34  ;;  %v1694_v2 = vrot.slane %v1693_v55, 2  ;;  %v1673_v3 = vadd.f32 %v1672_v57, %v1671_v54  ;;  %v1708_v47 = vrot.slane %v1707_v21, 2 }
 0x62d   :  { %v1653_v48 = vrot.slane %v1652_v22, 1  ;;  %v1688_v0 = vadd.f32 %v1687_v62, %v1686_v45  ;;  %v1667_v1 = vrot.slane %v1666_v63, 1  ;;  %v1702_v6 = vadd.f32 %v1701_v42, %v1700_v49 }
 0x62e   :  { %v1660_v28 = vrot.slane %v1659_v43, 1  ;;  %v1695_v27 = vadd.f32 %v1694_v2, %v1693_v55  ;;  %v1674_v29 = vrot.slane %v1673_v3, 1  ;;  %v1709_v30 = vadd.f32 %v1708_v47, %v1707_v21  ;;  %v1647_v55 = vld [vmem:[%s4885_s9] sm:$0x1]  ;;  %s2957_s9 = sshll.u32 %s3907_s8, 4  ;;  %s2958_s9 = int_to_ptr.vmem [resolvable:$true] %s2957_s9 }
 0x62f   :  { %v1689_v7 = vrot.slane %v1688_v0, 1  ;;  %v1703_v18 = vrot.slane %v1702_v6, 1  ;;  %v1654_v59 = vadd.f32 %v1653_v48, %v1652_v22  ;;  %v1668_v32 = vadd.f32 %v1667_v1, %v1666_v63  ;;  %p3862_p5 = scmp.lt.s32.totalorder %s2958_s9, %s2958_s9 }
 0x630   :  { %v1696_v19 = vrot.slane %v1695_v27, 1  ;;  %v1710_v24 = vrot.slane %v1709_v30, 1  ;;  %v1661_v36 = vadd.f32 %v1660_v28, %v1659_v43  ;;  %v1675_v5 = vadd.f32 %v1674_v29, %v1673_v3 }
 0x631   :  { %v1690_v31 = vadd.f32 %v1689_v7, %v1688_v0  ;;  %v1704_v35 = vadd.f32 %v1703_v18, %v1702_v6  ;;  %v3761_v18 = vld [vmem:[#allocation2] sm:$0xff] }
 0x632   :  { %v1697_v4 = vadd.f32 %v1696_v19, %v1695_v27  ;;  %v1711_v10 = vadd.f32 %v1710_v24, %v1709_v30  ;;  %v3762_v19 = vld [vmem:[#allocation2 + $0x8] sm:$0xff]  ;;  %v3763_v24 = vld [vmem:[#allocation2 + $0x10] sm:$0xff] }
 0x633   :  { %v1712_v16 = vsel %vm5048_vm5, %v1654_v59, %v1690_v31  ;;  %v1714_v17 = vsel %vm5049_vm8, %v1668_v32, %v1704_v35  ;;  %v3764_v59 = vld [vmem:[#allocation2 + $0x18] sm:$0xff]  ;;  %v3766_v31 = vld [vmem:[#allocation2 + $0x28] sm:$0xff]  ;;  %v3767_v35 = vld [vmem:[#allocation2 + $0x30] sm:$0xff] }
 0x634   :  { %v1713_v23 = vsel %vm5050_vm2, %v1661_v36, %v1697_v4  ;;  %v1715_v25 = vsel %vm5051_vm7, %v1675_v5, %v1711_v10  ;;  %v3768_v4 = vld [vmem:[#allocation2 + $0x38] sm:$0xff] }
 0x635   :  { %2788 = vmatprep.mubr.f32.mxu0 %v1713_v23  ;;  %2858 = vmatprep.mubr.f32.mxu1 %v1715_v25 }
 0x636   :  { %2789 = vmatmul.mubr.f32.vlgmr.msra.gmra.mrb[6].mxu0 %v1712_v16  ;;  %2859 = vmatmul.mubr.f32.vlgmr.msra.gmra.mrb[10].mxu1 %v1714_v17 }
 0x709   :  { %v3390_v33 = vpop.f32.mrb[6].mxu0  ;;  %v3425_v14 = vpop.f32.mrb[10].mxu1 }
 0x70a   :  { %v3391_v38 = vpop.f32.mrb[7].mxu0  ;;  %v3426_v15 = vpop.f32.mrb[11].mxu1 }
 0x70b   :  { %v3392_v39 = vadd.f32 %v3391_v38, %v3390_v33  ;;  %v3427_v40 = vadd.f32 %v3426_v15, %v3425_v14 }
 0x70d   :  { %v2861_v41 = vadd.f32 %v3427_v40, %v3392_v39 }
 0x70f   :  { %v2864_v60 = vmul.f32 0.0078125, %v2861_v41 }
 0x711   :  { %v2865_v61 = vmul.f32 %v2864_v60, %v2864_v60 }
 0x713   :  { %v2867_v34 = vrot.slane %v2865_v61, 7 }
 0x715   :  { %v2869_v26 = vsub.f32 %v2864_v60, %v2867_v34 }
 0x717   :  { %v2870_v54 = vadd.f32 1e-05, %v2869_v26 }
 0x719   :  { %3759 = vrsqrt.f32 %v2870_v54 }
 0x723   :  { %v3760_v56 = vpop.eup %3759 }
 0x724   :  { %v2879_v44 = vrot.slane %v3760_v56, %v4280_v11 }
 0x726   :  { %v2880_v45 = vcombine.high %v2879_v44, %v2879_v44 }
 0x728   :  { %v2887_v49 = vrot.slane %v2880_v45, %v4280_v11 }
 0x72a   :  { %v2889_v51 = vmul.f32 %v2887_v49, %v1646_v46 }
 0x72c   :  { %v2890_v57 = vmul.f32 %v2889_v51, %v2864_v60 }
 0x72e   :  { %v2891_v21 = vsub.f32 %v1647_v55, %v2890_v57 }
 0x730   :  { %v2896_v22 = vrot.slane %v2891_v21, %v4292_v50 }
 0x732   :  { %v2898_v62 = vsel %vm5052_vm6, %v2889_v51, %v2896_v22 }
 0x733   :  { %2900 = vrot.lane.b32.xlu0 %v2898_v62, %s3888_s23  ;;  %s3857_s23 = scalar_lea.vmem %s2958_s9, 1024 }
 0x734   :  { %p3858_p4 = scmp.ne.s32.totalorder %s2958_s9, %s3857_s23  ;;  %p3863_p6 = scmp.lt.s32.totalorder %s3857_s23, %s3857_s23 }
 0x736   :  { %p3864_p7 = por %p3863_p6, %p3862_p5 }
 0x738   :  { %p3865_p8 = pnand %p3864_p7, %p3858_p4 }
 0x7a5   :  { %v2901_v63 = vpop.permute.xlu0 %2900 }
 0x7a6   :  { %v2903_v42 = vsel %vm5053_vm4, %v2898_v62, %v2901_v63 }
 0x7a7   :  { %v2907_v43 = vrot.slane %v2903_v42, %v4292_v50  ;;  %v2919_v11 = vrot.slane %v2903_v42, %v4315_v58 }
 0x7a9   :  { %v2908_v2 = vmul.f32 %v2907_v43, %v4795_v20  ;;  %v2909_v3 = vmul.f32 %v2907_v43, %v4799_v13  ;;  %v2910_v47 = vmul.f32 %v2907_v43, %v4797_v12  ;;  %v2911_v48 = vmul.f32 %v2907_v43, %v4801_v53 }
 0x7aa   :  { %v2912_v0 = vmul.f32 %v2907_v43, %v4811_v8  ;;  %v2913_v1 = vmul.f32 %v2907_v43, %v4823_v37  ;;  %v2914_v6 = vmul.f32 %v2907_v43, %v4813_v9  ;;  %v2915_v28 = vmul.f32 %v2907_v43, %v4825_v52  ;;  %v3765_v9 = vld [vmem:[#allocation2 + $0x20] sm:$0xff] }
 0x7ab   :  { %v2920_v27 = vadd.f32 %v2919_v11, %v2908_v2  ;;  %v2921_v50 = vadd.f32 %v2919_v11, %v2909_v3  ;;  %v2922_v29 = vadd.f32 %v2919_v11, %v2910_v47  ;;  %v2923_v58 = vadd.f32 %v2919_v11, %v2911_v48 }
 0x7ac   :  { %v2924_v30 = vadd.f32 %v2919_v11, %v2912_v0  ;;  %v2925_v20 = vadd.f32 %v2919_v11, %v2913_v1  ;;  %v2926_v7 = vadd.f32 %v2919_v11, %v2914_v6  ;;  %v2927_v13 = vadd.f32 %v2919_v11, %v2915_v28 }
 0x7ad   :  { %v2928_v12 = vadd.f32 %v3761_v18, %v2920_v27  ;;  %v2929_v53 = vadd.f32 %v3762_v19, %v2921_v50  ;;  %v2930_v8 = vadd.f32 %v3763_v24, %v2922_v29  ;;  %v2931_v37 = vadd.f32 %v3764_v59, %v2923_v58 }
 0x7ae   :  { %v2932_v52 = vadd.f32 %v3765_v9, %v2924_v30  ;;  %v2933_v32 = vadd.f32 %v3766_v31, %v2925_v20  ;;  %v2934_v36 = vadd.f32 %v3767_v35, %v2926_v7  ;;  %v2935_v5 = vadd.f32 %v3768_v4, %v2927_v13 }
 0x7af   :  { %v2936_v10 = vmax.f32 %v2928_v12, 0.0  ;;  %v2937_v16 = vmax.f32 %v2929_v53, 0.0  ;;  %v2938_v17 = vmax.f32 %v2930_v8, 0.0  ;;  %v2939_v23 = vmax.f32 %v2931_v37, 0.0 }
 0x7b0   :  { %v2940_v25 = vmax.f32 %v2932_v52, 0.0  ;;  %v2941_v33 = vmax.f32 %v2933_v32, 0.0  ;;  %v2942_v14 = vmax.f32 %v2934_v36, 0.0  ;;  %v2943_v38 = vmax.f32 %v2935_v5, 0.0 }
 0x7b1   :  { %2944 = vst [vmem:[#allocation10] sm:$0xff] %v2936_v10  ;;  %2945 = vst [vmem:[#allocation10 + $0x8] sm:$0xff] %v2937_v16 }
 0x7b2   :  { %2946 = vst [vmem:[#allocation10 + $0x10] sm:$0xff] %v2938_v17  ;;  %2947 = vst [vmem:[#allocation10 + $0x18] sm:$0xff] %v2939_v23 }
 0x7b3   :  { %2948 = vst [vmem:[#allocation10 + $0x20] sm:$0xff] %v2940_v25  ;;  %2949 = vst [vmem:[#allocation10 + $0x28] sm:$0xff] %v2941_v33 }
 0x7b4   :  { %2950 = vst [vmem:[#allocation10 + $0x30] sm:$0xff] %v2942_v14  ;;  %2951 = vst [vmem:[#allocation10 + $0x38] sm:$0xff] %v2943_v38 }
 0x7b5   :  { %3868 = shalt.err (!%p3865_p8)
}
 0x7b6   :  { %s3869_s22 = scalar_lea.hbm %s4886_s10, 1024 }
 0x7b7   :  { %p3870_p9 = scmp.ne.s32.totalorder %s4886_s10, %s3869_s22  ;;  %p3873_p10 = scmp.lt.u32.totalorder %s3869_s22, %s4886_s10 }
 0x7b9   :  { %p3875_p11 = pnand %p3873_p10, %p3870_p9 }
 0x7bb   :  { %3878 = shalt.err (!%p3875_p11)
}
 0x7bc   :  { %2963 = dma.vmem_to_hbm [thread:$0]  %s2958_s9, 1024, %s4886_s10, [#allocation4], %s3891_s1, %s3891_s1, %s3892_s14  }
 0x7bd   :  { %3885 = dma.done.wait [#allocation4], 1024  }
 0x7be   :  { %3886 = vsyncadd [#allocation4], 4294966272 }
 0x7bf   :  { %2967 = vsyncpa [#allocation3], 1 }
 0x7c0   :  { %2968 = vsyncpa [#allocation6], 1 }
 0x7c1   :  { %2969 = vsyncpa [#allocation9], 1 }
 0x7c2   :  { %2970 = vsyncpa [#allocation4], 1 }

</bundles_post_ra>
